<compile_context>
chip_gen: v6e
topology: v6e:2x2x1
jax: 0.10.0
libtpu: 0.0.40
codegen_flags: <defaults>
</compile_context>

<pallas_src>
import math
from functools import partial

import jax
import jax.numpy as jnp
from jax import lax
from jax.experimental import pallas as pl
from jax.experimental.pallas import tpu as pltpu

LEAKY_SLOPE = 0.01   # nn.LeakyReLU default
BN_EPS = 1e-5        # nn.BatchNorm1d default
L2_EPS = 1e-12       # F.normalize default
LANE = 128           # TPU vreg lane width


def _round_up(v, m):
    return ((v + m - 1) // m) * m


def _fused_gcn_kernel(adj_ref, x_ref, w_ref, b_ref, pooled_ref, h_buf,
                      *, batch, tile_nodes, dp, hidden_dim, embedding_dim):
    """One grid step = (layer, node_tile).

    For the current layer and block of output nodes:
      y = adj[:, tile, :] @ h_prev @ W[layer] + b[layer]
      y = L2-normalize(y, dim=2); LeakyReLU; BatchNorm1d(num_nodes)
    then max-pool-accumulate over nodes into pooled[layer] and hand this
    tile's rows of y to the next layer through a ping-pong VMEM buffer.
    """
    lyr = pl.program_id(0)
    tile = pl.program_id(1)
    n_layers = pl.num_programs(0)

    # One-time: seed the ping-pong hidden-state buffer with the input features.
    @pl.when(jnp.logical_and(lyr == 0, tile == 0))
    def _():
        h_buf[0] = x_ref[...]

    src = lax.rem(lyr, 2)
    dst = lax.rem(lyr + 1, 2)

    # ---- GraphConv: (adj @ h) @ W + b  (bf16 MXU inputs, f32 accumulate) ----
    adj_t = adj_ref[...]                    # (B, TN, N)   matmul dtype
    h_src = h_buf[src]                      # (B, N, DP)   matmul dtype
    y = jnp.einsum('bij,bjd->bid', adj_t, h_src,
                   preferred_element_type=jnp.float32)          # (B, TN, DP)
    w = w_ref[0]                            # (DP, DP)
    y = jnp.dot(y.astype(w.dtype).reshape(batch * tile_nodes, dp), w,
                preferred_element_type=jnp.float32)
    y = y.reshape(batch, tile_nodes, dp) + b_ref[0]   # (1, DP) bias broadcast

    # ---- F.normalize(p=2, dim=2): padded feature lanes are exact zeros ----
    ssq = jnp.sum(y * y, axis=-1, keepdims=True)
    y = y * lax.rsqrt(jnp.maximum(ssq, L2_EPS * L2_EPS))         # EUP rsqrt

    # ---- LeakyReLU ----
    y = jnp.where(y >= 0.0, y, LEAKY_SLOPE * y)

    # ---- BatchNorm1d(num_nodes): training-mode batch stats per node over
    # (batch, true features), biased variance, identity affine.  Padded lanes
    # are zero so plain sums are exact; divide by the true element count. ----
    dout = jnp.where(lyr == n_layers - 1, embedding_dim, hidden_dim)
    inv_cnt = 1.0 / (batch * dout).astype(jnp.float32)
    s1 = jnp.sum(jnp.sum(y, axis=2, keepdims=True), axis=0, keepdims=True)
    s2 = jnp.sum(jnp.sum(y * y, axis=2, keepdims=True), axis=0, keepdims=True)
    mean = s1 * inv_cnt
    var = s2 * inv_cnt - mean * mean
    y = (y - mean) * lax.rsqrt(var + BN_EPS)
    # Re-zero padded feature lanes (BN shifted them off zero).
    lane_id = lax.broadcasted_iota(jnp.int32, (1, 1, dp), 2)
    y = jnp.where(lane_id < dout, y, 0.0)

    # ---- max-pool over nodes, running accumulation across node tiles ----
    tile_max = jnp.max(y, axis=1)           # (B, DP)

    @pl.when(tile == 0)
    def _():
        pooled_ref[0] = tile_max

    @pl.when(tile > 0)
    def _():
        pooled_ref[0] = jnp.maximum(pooled_ref[0], tile_max)

    # ---- hand this tile's rows to the next layer; the last layer's full
    # embedding is dead in the reference forward, so never store it ----
    @pl.when(lyr < n_layers - 1)
    def _():
        ns = pl.multiple_of(tile * tile_nodes, tile_nodes)
        h_buf[dst, :, pl.ds(ns, tile_nodes), :] = y.astype(h_buf.dtype)


def gcn_encoder_graph_forward(params, x, adj, *, tile_nodes=128,
                              matmul_dtype=jnp.bfloat16):
    """GcnEncoderGraph.forward (concat=True, num_aggs=1, bn=True, dropout=0,
    batch_num_nodes=None)."""
    conv_w, conv_b = params['conv_w'], params['conv_b']
    num_layers = len(conv_w)
    batch, n_nodes, input_dim = x.shape
    hidden_dim = int(conv_w[0].shape[1])
    embedding_dim = int(conv_w[-1].shape[1])
    douts = [int(w.shape[1]) for w in conv_w]

    # Lane-dense padded feature width shared by every layer.
    dp = _round_up(max([input_dim] + douts), LANE)

    # Node tile must divide N exactly (node padding would corrupt BN / max).
    tn = tile_nodes if (0 < tile_nodes <= n_nodes and n_nodes % tile_nodes == 0) \
        else n_nodes
    num_tiles = n_nodes // tn

    # ---- pack parameters into lane-dense stacked tensors ----
    w_all = jnp.zeros((num_layers, dp, dp), matmul_dtype)
    b_all = jnp.zeros((num_layers, 1, dp), jnp.float32)
    for i, (w, b) in enumerate(zip(conv_w, conv_b)):
        w_all = w_all.at[i, :w.shape[0], :w.shape[1]].set(w.astype(matmul_dtype))
        b_all = b_all.at[i, 0, :b.shape[0]].set(b.astype(jnp.float32))
    x_pad = jnp.zeros((batch, n_nodes, dp), matmul_dtype)
    x_pad = x_pad.at[:, :, :input_dim].set(x.astype(matmul_dtype))
    adj_c = adj.astype(matmul_dtype)

    # ---- VMEM budget: double-buffered blocks + ping-pong hidden state.
    # Tune tile_nodes per generation: smaller on v7x (64 MiB VMEM), larger
    # (256-512) on v5e/v6e (128 MiB). ----
    isz = jnp.dtype(matmul_dtype).itemsize
    est = (2 * batch * tn * n_nodes * isz        # adj tile (double-buffered)
           + 2 * batch * n_nodes * dp * isz      # x block
           + 2 * dp * dp * isz + 2 * dp * 4      # W, b blocks
           + 2 * batch * dp * 4                  # pooled output block
           + 2 * batch * n_nodes * dp * isz)     # h ping-pong scratch
    vmem_limit = min(max(2 * est, 8 * 1024 * 1024), 64 * 1024 * 1024)

    kernel = partial(_fused_gcn_kernel, batch=batch, tile_nodes=tn, dp=dp,
                     hidden_dim=hidden_dim, embedding_dim=embedding_dim)

    pooled = pl.pallas_call(
        kernel,
        out_shape=jax.ShapeDtypeStruct((num_layers, batch, dp), jnp.float32),
        grid_spec=pltpu.PrefetchScalarGridSpec(
            num_scalar_prefetch=0,
            grid=(num_layers, num_tiles),
            in_specs=[
                pl.BlockSpec((batch, tn, n_nodes), lambda l, t: (0, t, 0)),
                pl.BlockSpec((batch, n_nodes, dp), lambda l, t: (0, 0, 0)),
                pl.BlockSpec((1, dp, dp), lambda l, t: (l, 0, 0)),
                pl.BlockSpec((1, 1, dp), lambda l, t: (l, 0, 0)),
            ],
            out_specs=pl.BlockSpec((1, batch, dp), lambda l, t: (l, 0, 0)),
            scratch_shapes=[pltpu.VMEM((2, batch, n_nodes, dp), matmul_dtype)],
        ),
        compiler_params=pltpu.CompilerParams(
            # Both axes are sequential: layer l+1 reads every node tile of
            # layer l from the ping-pong scratch, and the pooled output
            # accumulates across node tiles.
            # TODO(synk): a per-layer variant with a "parallel" node axis could
            # use v7x's second TensorCore, at the cost of re-materializing h
            # through HBM.
            dimension_semantics=("arbitrary", "arbitrary"),
            vmem_limit_bytes=int(vmem_limit),
        ),
    )(adj_c, x_pad, w_all, b_all)

    # concat=True, num_aggs=1: slice the true feature widths and concat.
    out = jnp.concatenate(
        [pooled[i, :, :douts[i]] for i in range(num_layers)], axis=1)
    # Tiny prediction head stays in XLA (per perf review).
    return out @ params['pred_w'] + params['pred_b']


def reference_forward(params, x, adj, matmul_dtype=jnp.bfloat16):
    """Pure-JAX reference with the same precision policy as the kernel."""
    md = matmul_dtype
    adj_c = adj.astype(md)
    h = x.astype(md)
    pooled_all = []
    for w, b in zip(params['conv_w'], params['conv_b']):
        y = jnp.einsum('bij,bjd->bid', adj_c, h,
                       preferred_element_type=jnp.float32)
        y = jnp.einsum('bnd,de->bne', y.astype(md), w.astype(md),
                       preferred_element_type=jnp.float32)
        y = y + b.astype(jnp.float32)
        nrm = jnp.sqrt(jnp.sum(y * y, axis=-1, keepdims=True))
        y = y / jnp.maximum(nrm, L2_EPS)
        y = jnp.where(y >= 0.0, y, LEAKY_SLOPE * y)
        mean = jnp.mean(y, axis=(0, 2), keepdims=True)
        var = jnp.mean(jnp.square(y - mean), axis=(0, 2), keepdims=True)
        y = (y - mean) / jnp.sqrt(var + BN_EPS)
        pooled_all.append(jnp.max(y, axis=1))
        h = y.astype(md)
    out = jnp.concatenate(pooled_all, axis=1)
    return out @ params['pred_w'] + params['pred_b']


def init_params(key, input_dim, hidden_dim, embedding_dim, label_dim, num_layers):
    """Deterministic synthetic init matching the module's parameter shapes."""
    gain = math.sqrt(2.0)  # init.calculate_gain('relu')
    dims = ([(input_dim, hidden_dim)]
            + [(hidden_dim, hidden_dim)] * (num_layers - 2)
            + [(hidden_dim, embedding_dim)])
    keys = jax.random.split(key, len(dims) + 2)
    conv_w, conv_b = [], []
    for k, (din, dout) in zip(keys[:len(dims)], dims):
        bound = gain * math.sqrt(6.0 / (din + dout))       # xavier_uniform
        conv_w.append(jax.random.uniform(k, (din, dout), jnp.float32,
                                         -bound, bound))
        conv_b.append(jnp.zeros((dout,), jnp.float32))     # init.constant(0.)
    pred_in = hidden_dim * (num_layers - 1) + embedding_dim   # concat=True
    bound = 1.0 / math.sqrt(pred_in)                          # nn.Linear default
    pred_w = jax.random.uniform(keys[-2], (pred_in, label_dim), jnp.float32,
                                -bound, bound)
    pred_b = jax.random.uniform(keys[-1], (label_dim,), jnp.float32,
                                -bound, bound)
    return {'conv_w': conv_w, 'conv_b': conv_b,
            'pred_w': pred_w, 'pred_b': pred_b}


if __name__ == "__main__":
    batch, n_nodes = 2, 256
    input_dim, hidden_dim, embedding_dim, label_dim, num_layers = 8, 32, 16, 4, 3

    key = jax.random.PRNGKey(0)
    kx, kadj, kp = jax.random.split(key, 3)
    x = jax.random.normal(kx, (batch, n_nodes, input_dim), jnp.float32)
    # symmetric, self-looped dense adjacency
    a = jax.random.uniform(kadj, (batch, n_nodes, n_nodes), jnp.float32)
    adj = ((a + jnp.swapaxes(a, 1, 2)) * 0.5
           + jnp.eye(n_nodes, dtype=jnp.float32)[None])

    params = init_params(kp, input_dim, hidden_dim, embedding_dim,
                         label_dim, num_layers)

    fwd = jax.jit(partial(gcn_encoder_graph_forward, tile_nodes=128))
    ypred = fwd(params, x, adj)
    jax.block_until_ready(ypred)
    assert ypred.shape == (batch, label_dim) and ypred.dtype == jnp.float32

    # Validate against a pure-JAX reference with the same precision policy.
    ref = reference_forward(params, x, adj)
    err = float(jnp.max(jnp.abs(ypred - ref)))
    assert err < 5e-2, f"kernel deviates from reference: max abs err = {err}"
    print("KERNEL_OK")
</pallas_src>

<mosaic_0001>
module attributes {stable_mosaic.version = 11 : i64} {
  func.func @_fused_gcn_kernel(%arg0: i32, %arg1: i32, %arg2: memref<2x128x256xbf16, #tpu.memory_space<vmem>>, %arg3: memref<2x256x128xbf16, #tpu.memory_space<vmem>>, %arg4: memref<1x128x128xbf16, #tpu.memory_space<vmem>>, %arg5: memref<1x1x128xf32, #tpu.memory_space<vmem>>, %arg6: memref<1x2x128xf32, #tpu.memory_space<vmem>>, %arg7: memref<2x2x256x128xbf16, #tpu.memory_space<vmem>>) attributes {dimension_semantics = [#tpu.dimension_semantics<arbitrary>, #tpu.dimension_semantics<arbitrary>], iteration_bounds = array<i64: 3, 2>, scalar_prefetch = 0 : i64, scratch_operands = 1 : i64, tpu.core_type = #tpu.core_type<tc>, window_params = [{transform_indices = @transform_0, window_bounds = array<i64: 2, 128, 256>}, {pipeline_mode = #tpu.pipeline_mode<synchronous>, transform_indices = @transform_1, window_bounds = array<i64: 2, 256, 128>}, {transform_indices = @transform_2, window_bounds = array<i64: 1, 128, 128>}, {transform_indices = @transform_3, window_bounds = array<i64: 1, 1, 128>}, {transform_indices = @transform_4, window_bounds = array<i64: 1, 2, 128>}]} {
    %c0_i32 = arith.constant 0 : i32
    %0 = arith.cmpi eq, %arg0, %c0_i32 : i32
    %c0_i32_0 = arith.constant 0 : i32
    %1 = arith.cmpi eq, %arg1, %c0_i32_0 : i32
    %2 = arith.andi %0, %1 : i1
    %3 = arith.extui %2 : i1 to i32
    %c0_i32_1 = arith.constant 0 : i32
    %4 = arith.cmpi ne, %3, %c0_i32_1 : i32
    scf.if %4 {
      %c0_35 = arith.constant 0 : index
      %c0_36 = arith.constant 0 : index
      %c0_37 = arith.constant 0 : index
      %81 = vector.load %arg3[%c0_35, %c0_36, %c0_37] : memref<2x256x128xbf16, #tpu.memory_space<vmem>>, vector<2x256x128xbf16>
      %c0_38 = arith.constant 0 : index
      %c0_39 = arith.constant 0 : index
      %c0_40 = arith.constant 0 : index
      %c0_41 = arith.constant 0 : index
      %82 = vector.load %arg7[%c0_38, %c0_39, %c0_40, %c0_41] : memref<2x2x256x128xbf16, #tpu.memory_space<vmem>>, vector<1x2x256x128xbf16>
      %83 = vector.shape_cast %82 : vector<1x2x256x128xbf16> to vector<2x256x128xbf16>
      %84 = vector.shape_cast %81 : vector<2x256x128xbf16> to vector<1x2x256x128xbf16>
      tpu.vector_store %arg7[%c0_38, %c0_39, %c0_40, %c0_41], %84 {strides = array<i32>} : memref<2x2x256x128xbf16, #tpu.memory_space<vmem>>, vector<1x2x256x128xbf16>,
    } else {
    }
    %c2_i32 = arith.constant 2 : i32
    %5 = arith.remsi %arg0, %c2_i32 : i32
    %c1_i32 = arith.constant 1 : i32
    %6 = arith.addi %arg0, %c1_i32 : i32
    %c2_i32_2 = arith.constant 2 : i32
    %7 = arith.remsi %6, %c2_i32_2 : i32
    %c0 = arith.constant 0 : index
    %c0_3 = arith.constant 0 : index
    %c0_4 = arith.constant 0 : index
    %8 = vector.load %arg2[%c0, %c0_3, %c0_4] : memref<2x128x256xbf16, #tpu.memory_space<vmem>>, vector<2x128x256xbf16>
    %9 = arith.index_cast %5 : i32 to index
    %c0_5 = arith.constant 0 : index
    %c0_6 = arith.constant 0 : index
    %c0_7 = arith.constant 0 : index
    %10 = vector.load %arg7[%9, %c0_5, %c0_6, %c0_7] : memref<2x2x256x128xbf16, #tpu.memory_space<vmem>>, vector<1x2x256x128xbf16>
    %11 = vector.shape_cast %10 : vector<1x2x256x128xbf16> to vector<2x256x128xbf16>
    "tpu.trace_start"() <{level = 10 : i32, message = "bij,bjd->bid"}> : () -> ()
    %cst = arith.constant dense<0.000000e+00> : vector<2x128x128xf32>
    %12 = tpu.matmul %8, %11, %cst {dimension_numbers = #tpu.dot_dimension_numbers<[2], [1], [1], [2], [0, 0, 0, 1, 1, 2], [0], [0]>} : vector<2x128x256xbf16>, vector<2x256x128xbf16>, vector<2x128x128xf32> -> vector<2x128x128xf32>
    "tpu.trace_stop"() : () -> ()
    %c0_8 = arith.constant 0 : index
    %c0_9 = arith.constant 0 : index
    %c0_10 = arith.constant 0 : index
    %13 = vector.load %arg4[%c0_8, %c0_9, %c0_10] : memref<1x128x128xbf16, #tpu.memory_space<vmem>>, vector<1x128x128xbf16>
    %14 = vector.shape_cast %13 : vector<1x128x128xbf16> to vector<128x128xbf16>
    %15 = arith.truncf %12 : vector<2x128x128xf32> to vector<2x128x128xbf16>
    %16 = vector.shape_cast %15 : vector<2x128x128xbf16> to vector<256x128xbf16>
    %cst_11 = arith.constant dense<0.000000e+00> : vector<256x128xf32>
    %17 = tpu.matmul %16, %14, %cst_11 {dimension_numbers = #tpu.dot_dimension_numbers<[1], [0], [0], [1], [0, 0, 1, 1], [], []>} : vector<256x128xbf16>, vector<128x128xbf16>, vector<256x128xf32> -> vector<256x128xf32>
    %18 = vector.shape_cast %17 : vector<256x128xf32> to vector<2x128x128xf32>
    %c0_12 = arith.constant 0 : index
    %c0_13 = arith.constant 0 : index
    %c0_14 = arith.constant 0 : index
    %19 = vector.load %arg5[%c0_12, %c0_13, %c0_14] : memref<1x1x128xf32, #tpu.memory_space<vmem>>, vector<1x1x128xf32>
    %20 = vector.shape_cast %19 : vector<1x1x128xf32> to vector<1x128xf32>
    %21 = vector.shape_cast %20 : vector<1x128xf32> to vector<1x1x128xf32>
    %22 = vector.broadcast %21 : vector<1x1x128xf32> to vector<2x128x128xf32>
    %23 = arith.addf %18, %22 : vector<2x128x128xf32>
    %24 = arith.mulf %23, %23 : vector<2x128x128xf32>
    %cst_15 = arith.constant dense<0.000000e+00> : vector<2x128xf32>
    %25 = vector.multi_reduction <add>, %24, %cst_15 [2] : vector<2x128x128xf32> to vector<2x128xf32>
    %26 = vector.shape_cast %25 : vector<2x128xf32> to vector<2x128x1xf32>
    %cst_16 = arith.constant 1.000000e-24 : f32
    %27 = vector.broadcast %cst_16 : f32 to vector<2x128x1xf32>
    %28 = arith.maximumf %26, %27 : vector<2x128x1xf32>
    %29 = math.rsqrt %28 : vector<2x128x1xf32>
    %30 = vector.broadcast %29 : vector<2x128x1xf32> to vector<2x128x128xf32>
    %31 = arith.mulf %23, %30 : vector<2x128x128xf32>
    %cst_17 = arith.constant 0.000000e+00 : f32
    %32 = vector.broadcast %cst_17 : f32 to vector<2x128x128xf32>
    %33 = arith.cmpf oge, %31, %32 : vector<2x128x128xf32>
    %cst_18 = arith.constant 0.00999999977 : f32
    %34 = vector.broadcast %cst_18 : f32 to vector<2x128x128xf32>
    %35 = arith.mulf %34, %31 : vector<2x128x128xf32>
    %36 = arith.select %33, %31, %35 : vector<2x128x128xi1>, vector<2x128x128xf32>
    %c2_i32_19 = arith.constant 2 : i32
    %37 = arith.cmpi eq, %arg0, %c2_i32_19 : i32
    %c16_i32 = arith.constant 16 : i32
    %c32_i32 = arith.constant 32 : i32
    %38 = arith.select %37, %c16_i32, %c32_i32 : i32
    %c2_i32_20 = arith.constant 2 : i32
    %39 = arith.muli %c2_i32_20, %38 : i32
    %40 = arith.sitofp %39 : i32 to f32
    %cst_21 = arith.constant 1.000000e+00 : f32
    %41 = arith.divf %cst_21, %40 : f32
    %cst_22 = arith.constant dense<0.000000e+00> : vector<2x128xf32>
    %42 = vector.multi_reduction <add>, %36, %cst_22 [2] : vector<2x128x128xf32> to vector<2x128xf32>
    %43 = vector.shape_cast %42 : vector<2x128xf32> to vector<2x128x1xf32>
    %cst_23 = arith.constant dense<0.000000e+00> : vector<128x1xf32>
    %44 = vector.multi_reduction <add>, %43, %cst_23 [0] : vector<2x128x1xf32> to vector<128x1xf32>
    %45 = vector.shape_cast %44 : vector<128x1xf32> to vector<1x128x1xf32>
    %46 = arith.mulf %36, %36 : vector<2x128x128xf32>
    %cst_24 = arith.constant dense<0.000000e+00> : vector<2x128xf32>
    %47 = vector.multi_reduction <add>, %46, %cst_24 [2] : vector<2x128x128xf32> to vector<2x128xf32>
    %48 = vector.shape_cast %47 : vector<2x128xf32> to vector<2x128x1xf32>
    %cst_25 = arith.constant dense<0.000000e+00> : vector<128x1xf32>
    %49 = vector.multi_reduction <add>, %48, %cst_25 [0] : vector<2x128x1xf32> to vector<128x1xf32>
    %50 = vector.shape_cast %49 : vector<128x1xf32> to vector<1x128x1xf32>
    %51 = vector.broadcast %41 : f32 to vector<1x128x1xf32>
    %52 = arith.mulf %45, %51 : vector<1x128x1xf32>
    %53 = vector.broadcast %41 : f32 to vector<1x128x1xf32>
    %54 = arith.mulf %50, %53 : vector<1x128x1xf32>
    %55 = arith.mulf %52, %52 : vector<1x128x1xf32>
    %56 = arith.subf %54, %55 : vector<1x128x1xf32>
    %57 = vector.broadcast %52 : vector<1x128x1xf32> to vector<2x128x128xf32>
    %58 = arith.subf %36, %57 : vector<2x128x128xf32>
    %cst_26 = arith.constant 9.99999974E-6 : f32
    %59 = vector.broadcast %cst_26 : f32 to vector<1x128x1xf32>
    %60 = arith.addf %56, %59 : vector<1x128x1xf32>
    %61 = math.rsqrt %60 : vector<1x128x1xf32>
    %62 = vector.broadcast %61 : vector<1x128x1xf32> to vector<2x128x128xf32>
    %63 = arith.mulf %58, %62 : vector<2x128x128xf32>
    %64 = tpu.iota {dimensions = array<i32: 2>} : vector<1x1x128xi32>
    %65 = vector.broadcast %38 : i32 to vector<1x1x128xi32>
    %66 = arith.cmpi slt, %64, %65 : vector<1x1x128xi32>
    %cst_27 = arith.constant 0.000000e+00 : f32
    %67 = vector.shape_cast %66 : vector<1x1x128xi1> to vector<1x1x128xi1>
    %68 = vector.broadcast %67 : vector<1x1x128xi1> to vector<2x128x128xi1>
    %69 = vector.broadcast %cst_27 : f32 to vector<2x128x128xf32>
    %70 = arith.select %68, %63, %69 : vector<2x128x128xi1>, vector<2x128x128xf32>
    %cst_28 = arith.constant dense<0xFF800000> : vector<2x128xf32>
    %71 = vector.multi_reduction <maximumf>, %70, %cst_28 [1] : vector<2x128x128xf32> to vector<2x128xf32>
    %c0_i32_29 = arith.constant 0 : i32
    %72 = arith.cmpi eq, %arg1, %c0_i32_29 : i32
    %73 = arith.extui %72 : i1 to i32
    %c0_i32_30 = arith.constant 0 : i32
    %74 = arith.cmpi ne, %73, %c0_i32_30 : i32
    scf.if %74 {
      %c0_35 = arith.constant 0 : index
      %c0_36 = arith.constant 0 : index
      %c0_37 = arith.constant 0 : index
      %81 = vector.load %arg6[%c0_35, %c0_36, %c0_37] : memref<1x2x128xf32, #tpu.memory_space<vmem>>, vector<1x2x128xf32>
      %82 = vector.shape_cast %81 : vector<1x2x128xf32> to vector<2x128xf32>
      %83 = vector.shape_cast %71 : vector<2x128xf32> to vector<1x2x128xf32>
      tpu.vector_store %arg6[%c0_35, %c0_36, %c0_37], %83 {strides = array<i32>} : memref<1x2x128xf32, #tpu.memory_space<vmem>>, vector<1x2x128xf32>,
    } else {
    }
    %c0_i32_31 = arith.constant 0 : i32
    %75 = arith.cmpi sgt, %arg1, %c0_i32_31 : i32
    %76 = arith.extui %75 : i1 to i32
    %c0_i32_32 = arith.constant 0 : i32
    %77 = arith.cmpi ne, %76, %c0_i32_32 : i32
    scf.if %77 {
      %c0_35 = arith.constant 0 : index
      %c0_36 = arith.constant 0 : index
      %c0_37 = arith.constant 0 : index
      %81 = vector.load %arg6[%c0_35, %c0_36, %c0_37] : memref<1x2x128xf32, #tpu.memory_space<vmem>>, vector<1x2x128xf32>
      %82 = vector.shape_cast %81 : vector<1x2x128xf32> to vector<2x128xf32>
      %83 = arith.maximumf %82, %71 : vector<2x128xf32>
      %c0_38 = arith.constant 0 : index
      %c0_39 = arith.constant 0 : index
      %c0_40 = arith.constant 0 : index
      %84 = vector.load %arg6[%c0_38, %c0_39, %c0_40] : memref<1x2x128xf32, #tpu.memory_space<vmem>>, vector<1x2x128xf32>
      %85 = vector.shape_cast %84 : vector<1x2x128xf32> to vector<2x128xf32>
      %86 = vector.shape_cast %83 : vector<2x128xf32> to vector<1x2x128xf32>
      tpu.vector_store %arg6[%c0_38, %c0_39, %c0_40], %86 {strides = array<i32>} : memref<1x2x128xf32, #tpu.memory_space<vmem>>, vector<1x2x128xf32>,
    } else {
    }
    %c2_i32_33 = arith.constant 2 : i32
    %78 = arith.cmpi slt, %arg0, %c2_i32_33 : i32
    %79 = arith.extui %78 : i1 to i32
    %c0_i32_34 = arith.constant 0 : i32
    %80 = arith.cmpi ne, %79, %c0_i32_34 : i32
    scf.if %80 {
      %c128_i32 = arith.constant 128 : i32
      %81 = arith.muli %arg1, %c128_i32 : i32
      %82 = tpu.assume_multiple %81, 128 : i32
      %83 = arith.truncf %70 : vector<2x128x128xf32> to vector<2x128x128xbf16>
      %84 = arith.index_cast %7 : i32 to index
      %c0_35 = arith.constant 0 : index
      %85 = arith.index_cast %82 : i32 to index
      %c0_36 = arith.constant 0 : index
      %86 = vector.load %arg7[%84, %c0_35, %85, %c0_36] : memref<2x2x256x128xbf16, #tpu.memory_space<vmem>>, vector<1x2x128x128xbf16>
      %87 = vector.shape_cast %86 : vector<1x2x128x128xbf16> to vector<2x128x128xbf16>
      %88 = vector.shape_cast %83 : vector<2x128x128xbf16> to vector<1x2x128x128xbf16>
      tpu.vector_store %arg7[%84, %c0_35, %85, %c0_36], %88 {strides = array<i32>} : memref<2x2x256x128xbf16, #tpu.memory_space<vmem>>, vector<1x2x128x128xbf16>,
    } else {
    }
    return
  }
  func.func @transform_0(%arg0: i32, %arg1: i32) -> (i32, i32, i32) {
    %c0_i32 = arith.constant 0 : i32
    %c0_i32_0 = arith.constant 0 : i32
    %c0_i32_1 = arith.constant 0 : i32
    return %c0_i32, %arg1, %c0_i32_0 : i32, i32, i32
  }
  func.func @transform_1(%arg0: i32, %arg1: i32) -> (i32, i32, i32) {
    %c0_i32 = arith.constant 0 : i32
    %c0_i32_0 = arith.constant 0 : i32
    %c0_i32_1 = arith.constant 0 : i32
    %c0_i32_2 = arith.constant 0 : i32
    return %c0_i32, %c0_i32_0, %c0_i32_1 : i32, i32, i32
  }
  func.func @transform_2(%arg0: i32, %arg1: i32) -> (i32, i32, i32) {
    %c0_i32 = arith.constant 0 : i32
    %c0_i32_0 = arith.constant 0 : i32
    %c0_i32_1 = arith.constant 0 : i32
    return %arg0, %c0_i32, %c0_i32_0 : i32, i32, i32
  }
  func.func @transform_3(%arg0: i32, %arg1: i32) -> (i32, i32, i32) {
    %c0_i32 = arith.constant 0 : i32
    %c0_i32_0 = arith.constant 0 : i32
    %c0_i32_1 = arith.constant 0 : i32
    return %arg0, %c0_i32, %c0_i32_0 : i32, i32, i32
  }
  func.func @transform_4(%arg0: i32, %arg1: i32) -> (i32, i32, i32) {
    %c0_i32 = arith.constant 0 : i32
    %c0_i32_0 = arith.constant 0 : i32
    %c0_i32_1 = arith.constant 0 : i32
    return %arg0, %c0_i32, %c0_i32_0 : i32, i32, i32
  }
}

</mosaic_0001>

<bundles_post_ra>
// kernel: gcn_encoder_graph_forward.1
= control target key start
LH: loop header
LB: loop body
LE: loop exit
PB: predicated region body
PF: predicated region fallthrough
CT: control target
= control target key end

     0   :  { %s3297_s15 = smov 0   ;;  %s3299_s16 = smov 0   ;;  %s4475_s0 = inlined_call_operand.vmem [shape: bf16[2,256,256], index: 0, kind: input, shape index: {}]   ;;  %s4476_s1 = inlined_call_operand.vmem [shape: bf16[2,256,128], index: 1, kind: input, shape index: {}]   ;;  %s4477_s2 = inlined_call_operand.vmem [shape: bf16[3,128,128], index: 2, kind: input, shape index: {}]   ;;  %s4478_s3 = inlined_call_operand.vmem [shape: f32[3,1,128], index: 3, kind: input, shape index: {}]   ;;  %s4479_s4 = inlined_call_operand.vmem [shape: f32[3,2,128], index: 4, kind: output, shape index: {}]  }
   0x1   :  { %s3301_s17 = smov 0   ;;  %s3303_s18 = smov 0  }
   0x2   :  { %s3305_s19 = smov 0   ;;  %s3307_s20 = smov 0  }
   0x3   :  { %s3309_s21 = smov 0  }
   0x4 LB: > { %s23_s22 = sadd.s32 1, %s3262_s19  ;;  %s26_s23 = sadd.s32 1, %s3266_s20  ;;  %s3270_s21 = sphi %s3309_s21, %s14_s21   ;;  %s3266_s20 = sphi %s3307_s20, %s4535_s20   ;;  %s3262_s19 = sphi %s3305_s19, %s4534_s19   ;;  %s3258_s18 = sphi %s3303_s18, %s4533_s18   ;;  %s3254_s17 = sphi %s3301_s17, %s4532_s17   ;;  %s3250_s16 = sphi %s3299_s16, %s4531_s16   ;;  %s3246_s15 = sphi %s3297_s15, %s4530_s15  }
   0x5   : > { %p24_p0 = scmp.ge.s32.totalorder %s23_s22, 2  ;;  %s33_s24 = sadd.s32 1, %s3250_s16 }
   0x6   : > { %p40_p1 = scmp.ne.s32.totalorder %s3250_s16, %s3246_s15  ;;  %p41_p2 = scmp.eq.s32.totalorder %s3270_s21, 0 }
   0x7   : > { %s4537_s22 = smov (%p24_p0, %s23_s22), 0  ;;  %s4539_s23 = smov (!%p24_p0, %s26_s23), %s3266_s20 }
   0x8   : > { %s30_s25 = ssub.s32 %s3262_s19, %s4537_s22  ;;  %p42_p3 = por %p41_p2, %p40_p1 }
   0x9   : > { %p28_p4 = scmp.ge.s32.totalorder %s4539_s23, 3  ;;  %p31_p5 = scmp.eq.s32.totalorder %s30_s25, 0 }
   0xa   : > { %p2497_p6 = scmp.ge.s32.totalorder %s3270_s21, 6 }
   0xb   : > { %s4541_s23 = smov (%p28_p4, %s4539_s23), 0 }
   0xc   : > { %s3346_s26 = scalar_select %p31_p5, %s3250_s16, %s33_s24  }
   0xd   : > { %168 = sbr.rel (%p2497_p6) target bundleno = 38 (0x26), region = 20 }
  0x12   : > { %171 = sbr.rel (!%p42_p3) target bundleno = 38 (0x26), region = 24  ;;  %s173_s27 = sand.u32 (%p42_p3), 1, %s3250_s16  }
  0x13   : > { %s2626_s28 = sshll.u32 (%p42_p3), %s3262_s19, 7  ;;  %s2498_s29 = sshll.u32 (%p42_p3), %s173_s27, 8 }
  0x14   : > { %s3354_s6 = scalar_lea.vmem (%p42_p3), %s4475_s0, %s2626_s28  ;;  %s3359_s7 = scalar_lea.vmem (%p42_p3), [#allocation3], %s2498_s29 }
  0x15   : > { %v270_v0 = vld [vmem:[%s3354_s6] sm:$0xff] (%p42_p3)  ;;  %v272_v1 = vld [vmem:[%s3354_s6 + $0x8] sm:$0xff] (%p42_p3)  ;;  %v274_v2 = vld [vmem:[%s3354_s6 + $0x10] sm:$0xff] (%p42_p3) }
  0x16   : > { %271 = vst [vmem:[%s3359_s7] sm:$0xff] (%p42_p3), %v270_v0  ;;  %273 = vst [vmem:[%s3359_s7 + $0x8] sm:$0xff] (%p42_p3), %v272_v1  ;;  %v276_v3 = vld [vmem:[%s3354_s6 + $0x18] sm:$0xff] (%p42_p3)  ;;  %v278_v4 = vld [vmem:[%s3354_s6 + $0x20] sm:$0xff] (%p42_p3) }
  0x17   : > { %275 = vst [vmem:[%s3359_s7 + $0x10] sm:$0xff] %v274_v2  ;;  %v280_v5 = vld [vmem:[%s3354_s6 + $0x28] sm:$0xff]  ;;  %277 = vst [vmem:[%s3359_s7 + $0x18] sm:$0xff] %v276_v3  ;;  %v282_v6 = vld [vmem:[%s3354_s6 + $0x30] sm:$0xff] }
  0x18   : > { %279 = vst [vmem:[%s3359_s7 + $0x20] sm:$0xff] %v278_v4  ;;  %281 = vst [vmem:[%s3359_s7 + $0x28] sm:$0xff] %v280_v5  ;;  %v284_v7 = vld [vmem:[%s3354_s6 + $0x38] sm:$0xff]  ;;  %v286_v8 = vld [vmem:[%s3354_s6 + $0x40] sm:$0xff] }
  0x19   : > { %283 = vst [vmem:[%s3359_s7 + $0x30] sm:$0xff] %v282_v6  ;;  %285 = vst [vmem:[%s3359_s7 + $0x38] sm:$0xff] %v284_v7  ;;  %v288_v9 = vld [vmem:[%s3354_s6 + $0x48] sm:$0xff]  ;;  %v290_v10 = vld [vmem:[%s3354_s6 + $0x50] sm:$0xff] }
  0x1a   : > { %287 = vst [vmem:[%s3359_s7 + $0x40] sm:$0xff] %v286_v8  ;;  %v292_v11 = vld [vmem:[%s3354_s6 + $0x58] sm:$0xff]  ;;  %289 = vst [vmem:[%s3359_s7 + $0x48] sm:$0xff] %v288_v9  ;;  %v294_v12 = vld [vmem:[%s3354_s6 + $0x60] sm:$0xff] }
  0x1b   : > { %291 = vst [vmem:[%s3359_s7 + $0x50] sm:$0xff] %v290_v10  ;;  %293 = vst [vmem:[%s3359_s7 + $0x58] sm:$0xff] %v292_v11  ;;  %v296_v13 = vld [vmem:[%s3354_s6 + $0x68] sm:$0xff]  ;;  %v298_v14 = vld [vmem:[%s3354_s6 + $0x70] sm:$0xff] }
  0x1c   : > { %295 = vst [vmem:[%s3359_s7 + $0x60] sm:$0xff] %v294_v12  ;;  %297 = vst [vmem:[%s3359_s7 + $0x68] sm:$0xff] %v296_v13  ;;  %v300_v15 = vld [vmem:[%s3354_s6 + $0x78] sm:$0xff]  ;;  %v302_v16 = vld [vmem:[%s3354_s6 + $0x100] sm:$0xff] }
  0x1d   : > { %299 = vst [vmem:[%s3359_s7 + $0x70] sm:$0xff] %v298_v14  ;;  %v304_v17 = vld [vmem:[%s3354_s6 + $0x108] sm:$0xff]  ;;  %301 = vst [vmem:[%s3359_s7 + $0x78] sm:$0xff] %v300_v15  ;;  %v306_v18 = vld [vmem:[%s3354_s6 + $0x110] sm:$0xff] }
  0x1e   : > { %303 = vst [vmem:[%s3359_s7 + $0x80] sm:$0xff] %v302_v16  ;;  %305 = vst [vmem:[%s3359_s7 + $0x88] sm:$0xff] %v304_v17  ;;  %v308_v19 = vld [vmem:[%s3354_s6 + $0x118] sm:$0xff]  ;;  %v310_v20 = vld [vmem:[%s3354_s6 + $0x120] sm:$0xff] }
  0x1f   : > { %307 = vst [vmem:[%s3359_s7 + $0x90] sm:$0xff] %v306_v18  ;;  %309 = vst [vmem:[%s3359_s7 + $0x98] sm:$0xff] %v308_v19  ;;  %v312_v21 = vld [vmem:[%s3354_s6 + $0x128] sm:$0xff]  ;;  %v314_v22 = vld [vmem:[%s3354_s6 + $0x130] sm:$0xff] }
  0x20   : > { %311 = vst [vmem:[%s3359_s7 + $0xa0] sm:$0xff] %v310_v20  ;;  %v316_v23 = vld [vmem:[%s3354_s6 + $0x138] sm:$0xff]  ;;  %313 = vst [vmem:[%s3359_s7 + $0xa8] sm:$0xff] %v312_v21  ;;  %v318_v24 = vld [vmem:[%s3354_s6 + $0x140] sm:$0xff] }
  0x21   : > { %315 = vst [vmem:[%s3359_s7 + $0xb0] sm:$0xff] %v314_v22  ;;  %317 = vst [vmem:[%s3359_s7 + $0xb8] sm:$0xff] %v316_v23  ;;  %v320_v25 = vld [vmem:[%s3354_s6 + $0x148] sm:$0xff]  ;;  %v322_v26 = vld [vmem:[%s3354_s6 + $0x150] sm:$0xff] }
  0x22   : > { %319 = vst [vmem:[%s3359_s7 + $0xc0] sm:$0xff] %v318_v24  ;;  %321 = vst [vmem:[%s3359_s7 + $0xc8] sm:$0xff] %v320_v25  ;;  %v324_v27 = vld [vmem:[%s3354_s6 + $0x158] sm:$0xff]  ;;  %v326_v28 = vld [vmem:[%s3354_s6 + $0x160] sm:$0xff] }
  0x23   : > { %323 = vst [vmem:[%s3359_s7 + $0xd0] sm:$0xff] %v322_v26  ;;  %v328_v29 = vld [vmem:[%s3354_s6 + $0x168] sm:$0xff]  ;;  %325 = vst [vmem:[%s3359_s7 + $0xd8] sm:$0xff] %v324_v27  ;;  %v330_v30 = vld [vmem:[%s3354_s6 + $0x170] sm:$0xff] }
  0x24   : > { %327 = vst [vmem:[%s3359_s7 + $0xe0] sm:$0xff] %v326_v28  ;;  %329 = vst [vmem:[%s3359_s7 + $0xe8] sm:$0xff] %v328_v29  ;;  %v332_v31 = vld [vmem:[%s3354_s6 + $0x178] sm:$0xff] }
  0x25   : > { %331 = vst [vmem:[%s3359_s7 + $0xf0] sm:$0xff] %v330_v30  ;;  %333 = vst [vmem:[%s3359_s7 + $0xf8] sm:$0xff] %v332_v31 }
  0x26 PF: > { %p2502_p7 = scmp.ge.s32.totalorder %s3270_s21, 1  ;;  %p352_p8 = scmp.lt.s32.totalorder %s3270_s21, 7 }
  0x28   : > { %p353_p9 = pnand %p2502_p7, %p352_p8 }
  0x2a   : > { %356 = sbr.rel (%p353_p9) target bundleno = 1023 (0x3ff), region = 70 }
  0x2f   : > { %s359_s8 = sand.u32 1, %s3246_s15   ;;  %p392_p10 = scmp.lt.s32.totalorder %s3258_s18, 2 }
  0x30   : > { %s2503_s9 = sshll.u32 %s359_s8, 8  ;;  %p405_p11 = scmp.eq.s32.totalorder %s3258_s18, 0 }
  0x31   : > { %p406_p12 = scmp.eq.s32.totalorder %s3254_s17, 0  ;;  %s3447_s5 = scalar_lea.vmem [#allocation3], %s2503_s9 }
  0x32   : > { %s3429_s10 = scalar_select %p392_p10, %s3258_s18, 2 }
  0x33   : > { %p407_p13 = pnand %p406_p12, %p405_p11 }
  0x34   : > { %s2627_s11 = sshll.u32 %s3429_s10, 6  ;;  %s399_s14 = scalar_lea.vmem %s4478_s3, %s3429_s10 }
  0x35   : > { %s3439_s27 = scalar_lea.vmem %s4477_s2, %s2627_s11  ;;  %s2506_s15 = sshll.u32 %s3429_s10, 1 }
  0x36   : > { %s3445_s30 = scalar_lea.vmem %s4479_s4, %s2506_s15  ;;  %410 = sbr.rel (%p407_p13) target bundleno = 76 (0x4c), region = 78 }
  0x3b   : > { %v411_v32 = vld [vmem:[%s4476_s1] sm:$0xff]   ;;  %v413_v33 = vld [vmem:[%s4476_s1 + $0x8] sm:$0xff]   ;;  %v415_v34 = vld [vmem:[%s4476_s1 + $0x10] sm:$0xff]  }
  0x3c   : > { %475 = vst [vmem:[#allocation2] sm:$0xff] %v411_v32   ;;  %477 = vst [vmem:[#allocation2 + $0x8] sm:$0xff] %v413_v33   ;;  %v417_v35 = vld [vmem:[%s4476_s1 + $0x18] sm:$0xff]   ;;  %v419_v36 = vld [vmem:[%s4476_s1 + $0x20] sm:$0xff]  }
  0x3d   : > { %479 = vst [vmem:[#allocation2 + $0x10] sm:$0xff] %v415_v34   ;;  %v421_v37 = vld [vmem:[%s4476_s1 + $0x28] sm:$0xff]   ;;  %481 = vst [vmem:[#allocation2 + $0x18] sm:$0xff] %v417_v35   ;;  %v423_v38 = vld [vmem:[%s4476_s1 + $0x30] sm:$0xff]  }
  0x3e   : > { %483 = vst [vmem:[#allocation2 + $0x20] sm:$0xff] %v419_v36   ;;  %485 = vst [vmem:[#allocation2 + $0x28] sm:$0xff] %v421_v37   ;;  %v425_v39 = vld [vmem:[%s4476_s1 + $0x38] sm:$0xff]   ;;  %v427_v40 = vld [vmem:[%s4476_s1 + $0x40] sm:$0xff]  }
  0x3f   : > { %487 = vst [vmem:[#allocation2 + $0x30] sm:$0xff] %v423_v38   ;;  %489 = vst [vmem:[#allocation2 + $0x38] sm:$0xff] %v425_v39   ;;  %v429_v41 = vld [vmem:[%s4476_s1 + $0x48] sm:$0xff]   ;;  %v431_v42 = vld [vmem:[%s4476_s1 + $0x50] sm:$0xff]  }
  0x40   : > { %491 = vst [vmem:[#allocation2 + $0x40] sm:$0xff] %v427_v40   ;;  %v433_v43 = vld [vmem:[%s4476_s1 + $0x58] sm:$0xff]   ;;  %493 = vst [vmem:[#allocation2 + $0x48] sm:$0xff] %v429_v41   ;;  %v435_v44 = vld [vmem:[%s4476_s1 + $0x60] sm:$0xff]  }
  0x41   : > { %495 = vst [vmem:[#allocation2 + $0x50] sm:$0xff] %v431_v42   ;;  %497 = vst [vmem:[#allocation2 + $0x58] sm:$0xff] %v433_v43   ;;  %v437_v45 = vld [vmem:[%s4476_s1 + $0x68] sm:$0xff]   ;;  %v439_v46 = vld [vmem:[%s4476_s1 + $0x70] sm:$0xff]  }
  0x42   : > { %499 = vst [vmem:[#allocation2 + $0x60] sm:$0xff] %v435_v44   ;;  %501 = vst [vmem:[#allocation2 + $0x68] sm:$0xff] %v437_v45   ;;  %v441_v47 = vld [vmem:[%s4476_s1 + $0x78] sm:$0xff]   ;;  %v443_v48 = vld [vmem:[%s4476_s1 + $0x80] sm:$0xff]  }
  0x43   : > { %503 = vst [vmem:[#allocation2 + $0x70] sm:$0xff] %v439_v46   ;;  %v445_v49 = vld [vmem:[%s4476_s1 + $0x88] sm:$0xff]   ;;  %505 = vst [vmem:[#allocation2 + $0x78] sm:$0xff] %v441_v47   ;;  %v447_v50 = vld [vmem:[%s4476_s1 + $0x90] sm:$0xff]  }
  0x44   : > { %507 = vst [vmem:[#allocation2 + $0x80] sm:$0xff] %v443_v48   ;;  %509 = vst [vmem:[#allocation2 + $0x88] sm:$0xff] %v445_v49   ;;  %v449_v51 = vld [vmem:[%s4476_s1 + $0x98] sm:$0xff]   ;;  %v451_v52 = vld [vmem:[%s4476_s1 + $0xa0] sm:$0xff]  }
  0x45   : > { %511 = vst [vmem:[#allocation2 + $0x90] sm:$0xff] %v447_v50   ;;  %513 = vst [vmem:[#allocation2 + $0x98] sm:$0xff] %v449_v51   ;;  %v453_v53 = vld [vmem:[%s4476_s1 + $0xa8] sm:$0xff]   ;;  %v455_v54 = vld [vmem:[%s4476_s1 + $0xb0] sm:$0xff]  }
  0x46   : > { %515 = vst [vmem:[#allocation2 + $0xa0] sm:$0xff] %v451_v52   ;;  %v457_v55 = vld [vmem:[%s4476_s1 + $0xb8] sm:$0xff]   ;;  %517 = vst [vmem:[#allocation2 + $0xa8] sm:$0xff] %v453_v53   ;;  %v459_v56 = vld [vmem:[%s4476_s1 + $0xc0] sm:$0xff]  }
  0x47   : > { %519 = vst [vmem:[#allocation2 + $0xb0] sm:$0xff] %v455_v54   ;;  %521 = vst [vmem:[#allocation2 + $0xb8] sm:$0xff] %v457_v55   ;;  %v461_v57 = vld [vmem:[%s4476_s1 + $0xc8] sm:$0xff]   ;;  %v463_v58 = vld [vmem:[%s4476_s1 + $0xd0] sm:$0xff]  }
  0x48   : > { %523 = vst [vmem:[#allocation2 + $0xc0] sm:$0xff] %v459_v56   ;;  %525 = vst [vmem:[#allocation2 + $0xc8] sm:$0xff] %v461_v57   ;;  %v465_v59 = vld [vmem:[%s4476_s1 + $0xd8] sm:$0xff]   ;;  %v467_v60 = vld [vmem:[%s4476_s1 + $0xe0] sm:$0xff]  }
  0x49   : > { %527 = vst [vmem:[#allocation2 + $0xd0] sm:$0xff] %v463_v58   ;;  %v469_v61 = vld [vmem:[%s4476_s1 + $0xe8] sm:$0xff]   ;;  %529 = vst [vmem:[#allocation2 + $0xd8] sm:$0xff] %v465_v59   ;;  %v471_v62 = vld [vmem:[%s4476_s1 + $0xf0] sm:$0xff]  }
  0x4a   : > { %531 = vst [vmem:[#allocation2 + $0xe0] sm:$0xff] %v467_v60   ;;  %533 = vst [vmem:[#allocation2 + $0xe8] sm:$0xff] %v469_v61   ;;  %v473_v63 = vld [vmem:[%s4476_s1 + $0xf8] sm:$0xff]  }
  0x4b   : > { %535 = vst [vmem:[#allocation2 + $0xf0] sm:$0xff] %v471_v62   ;;  %537 = vst [vmem:[#allocation2 + $0xf8] sm:$0xff] %v473_v63  }
  0x4c PF: > { %p539_p0 = scmp.lt.s32.totalorder %s3258_s18, 0  ;;  %s540_s13 = ssub.s32 0, %s3258_s18  ;;  %v3048_v0 = vld [vmem:[%s3447_s5 + $0x4] ss:$8 sps:$4 sm:$0xff]   ;;  %v3046_v19 = vld [vmem:[%s3447_s5] ss:$8 sps:$4 sm:$0xff]  }
  0x4d   : > { %s2507_s11 = smin.u32 %s3258_s18, %s540_s13  ;;  %s545_s24 = sadd.s32 1, %s3258_s18  ;;  %v3051_v1 = vld [vmem:[%s3447_s5 + $0x44] ss:$8 sps:$4 sm:$0xff]   ;;  %859 = vmatprep.mubr.bf16.mxu0 %v3048_v0  ;;  %v3049_v20 = vld [vmem:[%s3447_s5 + $0x40] ss:$8 sps:$4 sm:$0xff]   ;;  %v3110_v40 = vld [vmem:[%s3439_s27 + $0x38] sm:$0xff]  }
  0x4e   : > { %s542_s25 = sand.u32 1, %s2507_s11   ;;  %p546_p1 = scmp.lt.s32.totalorder %s545_s24, 0  ;;  %891 = vmatprep.mubr.bf16.mxu1 %v3051_v1  ;;  %v3056_v21 = vld [vmem:[%s3447_s5 + $0x14] ss:$8 sps:$4 sm:$0xff]   ;;  %v3060_v27 = vld [vmem:[%s3447_s5 + $0x10] ss:$8 sps:$4 sm:$0xff]  }
  0x4f   : > { %s543_s9 = ssub.s32 0, %s542_s25  ;;  %s547_s15 = ssub.s32 0, %s545_s24  ;;  %v3058_v22 = vld [vmem:[%s3447_s5 + $0x54] ss:$8 sps:$4 sm:$0xff]   ;;  %v3061_v28 = vld [vmem:[%s3447_s5 + $0x50] ss:$8 sps:$4 sm:$0xff]  }
  0x50   : > { %s4543_s9 = smov (!%p539_p0, %s543_s9), %s542_s25  ;;  %s2508_s28 = smin.u32 %s547_s15, %s545_s24  ;;  %v3066_v29 = vld [vmem:[%s3447_s5 + $0x24] ss:$8 sps:$4 sm:$0xff]   ;;  %v3070_v34 = vld [vmem:[%s3447_s5 + $0x20] ss:$8 sps:$4 sm:$0xff]   ;;  %v3076_v38 = vld [vmem:[%s3447_s5 + $0x34] ss:$8 sps:$4 sm:$0xff]  }
  0x51   : > { %s549_s29 = sand.u32 1, %s2508_s28   ;;  %s2628_s6 = sshll.u32 %s4543_s9, 8  ;;  %v3068_v30 = vld [vmem:[%s3447_s5 + $0x64] ss:$8 sps:$4 sm:$0xff]   ;;  %v3071_v35 = vld [vmem:[%s3447_s5 + $0x60] ss:$8 sps:$4 sm:$0xff]  }
  0x52   : > { %s550_s7 = ssub.s32 0, %s549_s29  ;;  %s3553_s8 = scalar_lea.vmem [#allocation2], %s2628_s6  ;;  %v3078_v41 = vld [vmem:[%s3447_s5 + $0x74] ss:$8 sps:$4 sm:$0xff]   ;;  %v3112_v44 = vld [vmem:[%s3439_s27 + $0x28] sm:$0xff]   ;;  %v3113_v51 = vld [vmem:[%s3439_s27 + $0x20] sm:$0xff]  }
  0x53   : > { %s4545_s7 = smov (!%p546_p1, %s550_s7), %s549_s29  ;;  %v3030_v2 = vld [vmem:[%s3553_s8 + $0x78] sm:$0xff]   ;;  %v3032_v4 = vld [vmem:[%s3553_s8 + $0x70] sm:$0xff]   ;;  %v3034_v6 = vld [vmem:[%s3553_s8 + $0x68] sm:$0xff]   ;;  %p1765_p2 = scmp.eq.s32.totalorder %s3258_s18, 2 }
  0x54   : > { %v3031_v3 = vld [vmem:[%s3553_s8 + $0x38] sm:$0xff]   ;;  %2756 = vmatprep.subr.bf16.mxu0 %v3030_v2  ;;  %2956 = vmatprep.subr.bf16.mxu1 %v3030_v2  ;;  %v3033_v5 = vld [vmem:[%s3553_s8 + $0x30] sm:$0xff]   ;;  %v3035_v7 = vld [vmem:[%s3553_s8 + $0x28] sm:$0xff]   ;;  %p2585_p3 = scmp.ne.s32.totalorder %s3254_s17, 0 }
  0x55   : > { %2757 = vmatpush3.bf16.msra.mxu0 %v3031_v3  ;;  %2964 = vmatpush3.bf16.msra.mxu1 %v3031_v3  ;;  %v3036_v8 = vld [vmem:[%s3553_s8 + $0x60] sm:$0xff]   ;;  %v3038_v10 = vld [vmem:[%s3553_s8 + $0x58] sm:$0xff]   ;;  %v3040_v12 = vld [vmem:[%s3553_s8 + $0x50] sm:$0xff]   ;;  %s3808_s10 = scalar_select %p1765_p2, 16, 32 }
  0x56   : > { %2758 = vmatprep.subr.bf16.mxu0 %v3032_v4  ;;  %2957 = vmatprep.subr.bf16.mxu1 %v3032_v4  ;;  %v3037_v9 = vld [vmem:[%s3553_s8 + $0x20] sm:$0xff]   ;;  %v3039_v11 = vld [vmem:[%s3553_s8 + $0x18] sm:$0xff]   ;;  %v3041_v13 = vld [vmem:[%s3553_s8 + $0x10] sm:$0xff]  }
  0x57   : > { %v3042_v14 = vld [vmem:[%s3553_s8 + $0x48] sm:$0xff]   ;;  %v3044_v16 = vld [vmem:[%s3553_s8 + $0x40] sm:$0xff]   ;;  %v3052_v18 = vld [vmem:[%s3553_s8 + $0xf8] sm:$0xff]  }
  0x58   : > { %v3043_v15 = vld [vmem:[%s3553_s8 + $0x8] sm:$0xff]   ;;  %v3045_v17 = vld [vmem:[%s3553_s8] sm:$0xff]   ;;  %v3053_v23 = vld [vmem:[%s3553_s8 + $0xb8] sm:$0xff]  }
  0x59   : > { %2759 = vmatpush3.bf16.msra.mxu0 %v3033_v5  ;;  %2965 = vmatpush3.bf16.msra.mxu1 %v3033_v5  ;;  %v3054_v24 = vld [vmem:[%s3553_s8 + $0xf0] sm:$0xff]   ;;  %v3062_v26 = vld [vmem:[%s3553_s8 + $0xe8] sm:$0xff]   ;;  %v3064_v32 = vld [vmem:[%s3553_s8 + $0xe0] sm:$0xff]  }
  0x5a   : > { %2760 = vmatprep.subr.bf16.mxu0 %v3034_v6  ;;  %2958 = vmatprep.subr.bf16.mxu1 %v3034_v6  ;;  %v3055_v25 = vld [vmem:[%s3553_s8 + $0xb0] sm:$0xff]   ;;  %v3063_v31 = vld [vmem:[%s3553_s8 + $0xa8] sm:$0xff]   ;;  %v3065_v33 = vld [vmem:[%s3553_s8 + $0xa0] sm:$0xff]  }
  0x5b   : > { %v3072_v36 = vld [vmem:[%s3553_s8 + $0xd8] sm:$0xff]   ;;  %v3074_v39 = vld [vmem:[%s3553_s8 + $0xd0] sm:$0xff]   ;;  %v3082_v45 = vld [vmem:[%s3553_s8 + $0xc8] sm:$0xff]  }
  0x5c   : > { %v3073_v37 = vld [vmem:[%s3553_s8 + $0x98] sm:$0xff]   ;;  %v3111_v42 = vld [vmem:[%s3439_s27 + $0x30] sm:$0xff]   ;;  %v3083_v48 = vld [vmem:[%s3553_s8 + $0x88] sm:$0xff]  }
  0x5d   : > { %2761 = vmatpush3.bf16.msra.mxu0 %v3035_v7  ;;  %2966 = vmatpush3.bf16.msra.mxu1 %v3035_v7  ;;  %v3075_v43 = vld [vmem:[%s3553_s8 + $0x90] sm:$0xff]   ;;  %v3088_v49 = vld [vmem:[%s3447_s5 + $0x84] ss:$8 sps:$4 sm:$0xff]   ;;  %v3086_v53 = vld [vmem:[%s3447_s5 + $0x80] ss:$8 sps:$4 sm:$0xff]  }
  0x5e   : > { %2762 = vmatprep.subr.bf16.mxu0 %v3036_v8  ;;  %2959 = vmatprep.subr.bf16.mxu1 %v3036_v8  ;;  %v3080_v46 = vld [vmem:[%s3447_s5 + $0x30] ss:$8 sps:$4 sm:$0xff]   ;;  %v3084_v50 = vld [vmem:[%s3553_s8 + $0xc0] sm:$0xff]   ;;  %v3089_v54 = vld [vmem:[%s3447_s5 + $0x94] ss:$8 sps:$4 sm:$0xff]  }
  0x5f   : > { %v3081_v47 = vld [vmem:[%s3447_s5 + $0x70] ss:$8 sps:$4 sm:$0xff]   ;;  %v3085_v52 = vld [vmem:[%s3553_s8 + $0x80] sm:$0xff]   ;;  %v3095_v58 = vld [vmem:[%s3447_s5 + $0xb4] ss:$8 sps:$4 sm:$0xff]  }
  0x60   : > { %v3091_v55 = vld [vmem:[%s3447_s5 + $0x90] ss:$8 sps:$4 sm:$0xff]   ;;  %v3092_v56 = vld [vmem:[%s3447_s5 + $0xa4] ss:$8 sps:$4 sm:$0xff]   ;;  %v3094_v57 = vld [vmem:[%s3447_s5 + $0xa0] ss:$8 sps:$4 sm:$0xff]  }
  0x61   : > { %2763 = vmatpush3.bf16.msra.mxu0 %v3037_v9  ;;  %2967 = vmatpush3.bf16.msra.mxu1 %v3037_v9  ;;  %v3097_v59 = vld [vmem:[%s3447_s5 + $0xb0] ss:$8 sps:$4 sm:$0xff]   ;;  %v3098_v60 = vld [vmem:[%s3447_s5 + $0xc4] ss:$8 sps:$4 sm:$0xff]   ;;  %v3100_v61 = vld [vmem:[%s3447_s5 + $0xc0] ss:$8 sps:$4 sm:$0xff]  }
  0x62   : > { %2764 = vmatprep.subr.bf16.mxu0 %v3038_v10  ;;  %2960 = vmatprep.subr.bf16.mxu1 %v3038_v10  ;;  %v3101_v62 = vld [vmem:[%s3447_s5 + $0xd4] ss:$8 sps:$4 sm:$0xff]   ;;  %v3103_v0 = vld [vmem:[%s3447_s5 + $0xd0] ss:$8 sps:$4 sm:$0xff]   ;;  %v3104_v1 = vld [vmem:[%s3447_s5 + $0xe4] ss:$8 sps:$4 sm:$0xff]  }
  0x63   : > { %v3114_v63 = vld [vmem:[%s3439_s27 + $0x18] sm:$0xff]   ;;  %v3115_v2 = vld [vmem:[%s3439_s27 + $0x10] sm:$0xff]   ;;  %v3116_v3 = vld [vmem:[%s3439_s27 + $0x8] sm:$0xff]  }
  0x64   : > { %v3106_v4 = vld [vmem:[%s3447_s5 + $0xe0] ss:$8 sps:$4 sm:$0xff]   ;;  %v3107_v5 = vld [vmem:[%s3447_s5 + $0xf4] ss:$8 sps:$4 sm:$0xff]   ;;  %v3109_v7 = vld [vmem:[%s3447_s5 + $0xf0] ss:$8 sps:$4 sm:$0xff]  }
  0x65   : > { %2765 = vmatpush3.bf16.msra.mxu0 %v3039_v11  ;;  %2968 = vmatpush3.bf16.msra.mxu1 %v3039_v11  ;;  %v3117_v6 = vld [vmem:[%s3439_s27] sm:$0xff]  }
  0x66   : > { %2766 = vmatprep.subr.bf16.mxu0 %v3040_v12  ;;  %2961 = vmatprep.subr.bf16.mxu1 %v3040_v12 }
  0x69   : > { %2767 = vmatpush3.bf16.msra.mxu0 %v3041_v13  ;;  %2969 = vmatpush3.bf16.msra.mxu1 %v3041_v13 }
  0x6a   : > { %2768 = vmatprep.subr.bf16.mxu0 %v3042_v14  ;;  %2962 = vmatprep.subr.bf16.mxu1 %v3042_v14 }
  0x6d   : > { %2769 = vmatpush3.bf16.msra.mxu0 %v3043_v15  ;;  %2970 = vmatpush3.bf16.msra.mxu1 %v3043_v15 }
  0x6e   : > { %2770 = vmatprep.subr.bf16.mxu0 %v3044_v16  ;;  %2963 = vmatprep.subr.bf16.mxu1 %v3044_v16 }
  0x71   : > { %2771 = vmatpush3.bf16.msra.mxu0 %v3045_v17  ;;  %2971 = vmatpush3.bf16.msra.mxu1 %v3045_v17 }
  0x72   : > { %2820 = vmatprep.subr.bf16.mxu1 %v3052_v18  ;;  %2908 = vmatprep.subr.bf16.mxu0 %v3110_v40 }
  0x74   : > { %860 = vmatmul.mubr.bf16.vlgmr.msra.gmra.mxu0 %v3046_v19  ;;  %892 = vmatmul.mubr.bf16.vlgmr.msra.gmra.mxu1 %v3049_v20 }
  0x75   : > { %2821 = vmatpush3.bf16.msra.mxu1 %v3053_v23  ;;  %867 = vmatprep.mubr.bf16.mxu0 %v3056_v21 }
  0x76   : > { %2822 = vmatprep.subr.bf16.mxu1 %v3054_v24  ;;  %899 = vmatprep.mubr.bf16.mxu1 %v3058_v22 }
  0x77   : > { %2909 = vmatpush3.bf16.msra.mxu0 %v3110_v40 }
  0x78   : > { %2910 = vmatprep.subr.bf16.mxu0 %v3111_v42 }
  0x79   : > { %2823 = vmatpush3.bf16.msra.mxu1 %v3055_v25 }
  0x7a   : > { %2824 = vmatprep.subr.bf16.mxu1 %v3062_v26 }
  0x7b   : > { %2911 = vmatpush3.bf16.msra.mxu0 %v3111_v42 }
  0x7c   : > { %868 = vmatmul.mubr.bf16.gmra.mxu0 %v3060_v27  ;;  %900 = vmatmul.mubr.bf16.gmra.mxu1 %v3061_v28 }
  0x7d   : > { %2825 = vmatpush3.bf16.msra.mxu1 %v3063_v31  ;;  %875 = vmatprep.mubr.bf16.mxu0 %v3066_v29 }
  0x7e   : > { %2826 = vmatprep.subr.bf16.mxu1 %v3064_v32  ;;  %907 = vmatprep.mubr.bf16.mxu1 %v3068_v30 }
  0x7f   : > { %2912 = vmatprep.subr.bf16.mxu0 %v3112_v44 }
  0x80   : > { %2913 = vmatpush3.bf16.msra.mxu0 %v3112_v44 }
  0x81   : > { %2827 = vmatpush3.bf16.msra.mxu1 %v3065_v33  ;;  %2914 = vmatprep.subr.bf16.mxu0 %v3113_v51 }
  0x82   : > { %2828 = vmatprep.subr.bf16.mxu1 %v3072_v36 }
  0x84   : > { %876 = vmatmul.mubr.bf16.gmra.mxu0 %v3070_v34  ;;  %908 = vmatmul.mubr.bf16.gmra.mxu1 %v3071_v35 }
  0x85   : > { %2829 = vmatpush3.bf16.msra.mxu1 %v3073_v37  ;;  %883 = vmatprep.mubr.bf16.mxu0 %v3076_v38 }
  0x86   : > { %2830 = vmatprep.subr.bf16.mxu1 %v3074_v39  ;;  %915 = vmatprep.mubr.bf16.mxu1 %v3078_v41 }
  0x87   : > { %2915 = vmatpush3.bf16.msra.mxu0 %v3113_v51 }
  0x88   : > { %2916 = vmatprep.subr.bf16.mxu0 %v3114_v63 }
  0x89   : > { %2831 = vmatpush3.bf16.msra.mxu1 %v3075_v43 }
  0x8a   : > { %2832 = vmatprep.subr.bf16.mxu1 %v3082_v45 }
  0x8b   : > { %2917 = vmatpush3.bf16.msra.mxu0 %v3114_v63 }
  0x8c   : > { %884 = vmatmul.mubr.bf16.gmra.mxu0 %v3080_v46  ;;  %916 = vmatmul.mubr.bf16.gmra.mxu1 %v3081_v47 }
  0x8d   : > { %2833 = vmatpush3.bf16.msra.mxu1 %v3083_v48  ;;  %1132 = vmatprep.mubr.bf16.mxu1 %v3088_v49 }
  0x8e   : > { %2834 = vmatprep.subr.bf16.mxu1 %v3084_v50  ;;  %2918 = vmatprep.subr.bf16.mxu0 %v3115_v2 }
  0x8f   : > { %2919 = vmatpush3.bf16.msra.mxu0 %v3115_v2 }
  0x90   : > { %2920 = vmatprep.subr.bf16.mxu0 %v3116_v3 }
  0x91   : > { %2835 = vmatpush3.bf16.msra.mxu1 %v3085_v52 }
  0x93   : > { %2921 = vmatpush3.bf16.msra.mxu0 %v3116_v3 }
  0x94   : > { %1133 = vmatmul.mubr.bf16.vlgmr.msra.gmra.mxu1 %v3086_v53  ;;  %2922 = vmatprep.subr.bf16.mxu0 %v3117_v6 }
  0x95   : > { %1140 = vmatprep.mubr.bf16.mxu1 %v3089_v54 }
  0x97   : > { %2923 = vmatpush3.bf16.msra.mxu0 %v3117_v6 }
  0x9c   : > { %1141 = vmatmul.mubr.bf16.gmra.mxu1 %v3091_v55 }
  0x9d   : > { %1148 = vmatprep.mubr.bf16.mxu1 %v3092_v56 }
  0xa4   : > { %1149 = vmatmul.mubr.bf16.gmra.mxu1 %v3094_v57 }
  0xa5   : > { %1156 = vmatprep.mubr.bf16.mxu1 %v3095_v58 }
  0xac   : > { %1157 = vmatmul.mubr.bf16.gmra.mxu1 %v3097_v59 }
  0xad   : > { %1164 = vmatprep.mubr.bf16.mxu1 %v3098_v60 }
  0xb4   : > { %1165 = vmatmul.mubr.bf16.gmra.mxu1 %v3100_v61 }
  0xb5   : > { %1172 = vmatprep.mubr.bf16.mxu1 %v3101_v62 }
  0xbc   : > { %1173 = vmatmul.mubr.bf16.gmra.mxu1 %v3103_v0 }
  0xbd   : > { %1180 = vmatprep.mubr.bf16.mxu1 %v3104_v1 }
  0xc4   : > { %1181 = vmatmul.mubr.bf16.gmra.mxu1 %v3106_v4 }
  0xc5   : > { %1188 = vmatprep.mubr.bf16.mxu1 %v3107_v5 }
  0xcc   : > { %1189 = vmatmul.mubr.bf16.gmra.mxu1 %v3109_v7 }
 0x134   : > { %v2772_v8 = vpop.f32.mrf.mxu0  ;;  %v2796_v9 = vpop.f32.mrf.mxu1 }
 0x136   : > { %v2773_v10 = vpop.f32.mrf.mxu0  ;;  %v2797_v11 = vpop.f32.mrf.mxu1 }
 0x137   : > { %v2774_v16 = vadd.f32 %v2773_v10, %v2772_v8  ;;  %v2798_v45 = vadd.f32 %v2797_v11, %v2796_v9 }
 0x138   : > { %v2775_v12 = vpop.f32.mrf.mxu0  ;;  %v2799_v13 = vpop.f32.mrf.mxu1 }
 0x13a   : > { %v2776_v14 = vpop.f32.mrf.mxu0  ;;  %v2800_v15 = vpop.f32.mrf.mxu1 }
 0x13b   : > { %v2777_v17 = vadd.f32 %v2776_v14, %v2775_v12  ;;  %v2801_v46 = vadd.f32 %v2800_v15, %v2799_v13 }
 0x13c   : > { %v2778_v18 = vpop.f32.mrf.mxu0  ;;  %v2802_v19 = vpop.f32.mrf.mxu1 }
 0x13d   : > { %v1213_v20 = vpack.c.bf16 %v2777_v17, %v2774_v16  ;;  %v1217_v53 = vpack.c.bf16 %v2801_v46, %v2798_v45 }
 0x13e   : > { %v2779_v21 = vpop.f32.mrf.mxu0  ;;  %v2803_v22 = vpop.f32.mrf.mxu1 }
 0x13f   : > { %2924 = vmatprep.mubr.bf16.mxu0 %v1213_v20  ;;  %v2780_v27 = vadd.f32 %v2779_v21, %v2778_v18  ;;  %v2804_v57 = vadd.f32 %v2803_v22, %v2802_v19 }
 0x140   : > { %v2781_v23 = vpop.f32.mrf.mxu0  ;;  %v2805_v24 = vpop.f32.mrf.mxu1 }
 0x142   : > { %v2782_v25 = vpop.f32.mrf.mxu0  ;;  %v2806_v26 = vpop.f32.mrf.mxu1 }
 0x143   : > { %v2783_v28 = vadd.f32 %v2782_v25, %v2781_v23  ;;  %v2807_v58 = vadd.f32 %v2806_v26, %v2805_v24 }
 0x144   : > { %v2784_v29 = vpop.f32.mrf.mxu0  ;;  %v2808_v30 = vpop.f32.mrf.mxu1 }
 0x145   : > { %v1214_v31 = vpack.c.bf16 %v2783_v28, %v2780_v27  ;;  %v1218_v63 = vpack.c.bf16 %v2807_v58, %v2804_v57 }
 0x146   : > { %v2785_v32 = vpop.f32.mrf.mxu0  ;;  %v2809_v33 = vpop.f32.mrf.mxu1 }
 0x147   : > { %2925 = vmatmul.mubr.bf16.vlgmr.msra.gmra.mxu0 %v1214_v31  ;;  %v2786_v38 = vadd.f32 %v2785_v32, %v2784_v29  ;;  %v2810_v59 = vadd.f32 %v2809_v33, %v2808_v30 }
 0x148   : > { %v2787_v34 = vpop.f32.mrf.mxu0  ;;  %v2811_v35 = vpop.f32.mrf.mxu1 }
 0x14a   : > { %v2788_v36 = vpop.f32.mrf.mxu0  ;;  %v2812_v37 = vpop.f32.mrf.mxu1 }
 0x14b   : > { %v2789_v39 = vadd.f32 %v2788_v36, %v2787_v34  ;;  %v2813_v60 = vadd.f32 %v2812_v37, %v2811_v35 }
 0x14c   : > { %v2790_v40 = vpop.f32.mrf.mxu0  ;;  %v2814_v41 = vpop.f32.mrf.mxu1 }
 0x14d   : > { %v1215_v42 = vpack.c.bf16 %v2789_v39, %v2786_v38  ;;  %v1219_v0 = vpack.c.bf16 %v2813_v60, %v2810_v59 }
 0x14e   : > { %v2791_v43 = vpop.f32.mrf.mxu0  ;;  %v2815_v44 = vpop.f32.mrf.mxu1 }
 0x14f   : > { %2928 = vmatprep.mubr.bf16.mxu0 %v1215_v42  ;;  %v2792_v51 = vadd.f32 %v2791_v43, %v2790_v40  ;;  %v2816_v3 = vadd.f32 %v2815_v44, %v2814_v41 }
 0x150   : > { %v2793_v47 = vpop.f32.mrf.mxu0  ;;  %v2817_v48 = vpop.f32.mrf.mxu1 }
 0x152   : > { %v2794_v49 = vpop.f32.mrf.mxu0  ;;  %v2818_v50 = vpop.f32.mrf.mxu1 }
 0x153   : > { %v2795_v52 = vadd.f32 %v2794_v49, %v2793_v47  ;;  %v2819_v4 = vadd.f32 %v2818_v50, %v2817_v48 }
 0x154   : > { %v2836_v54 = vpop.f32.mrf.mxu1 }
 0x155   : > { %v1216_v55 = vpack.c.bf16 %v2795_v52, %v2792_v51  ;;  %v1220_v9 = vpack.c.bf16 %v2819_v4, %v2816_v3 }
 0x156   : > { %v2837_v56 = vpop.f32.mrf.mxu1 }
 0x157   : > { %2929 = vmatmul.mubr.bf16.gmra.mxu0 %v1216_v55  ;;  %v2838_v5 = vadd.f32 %v2837_v56, %v2836_v54  ;;  %v3630_v56 = vld [vmem:[%s399_s14] ss:$0 sm:$0xff]  ;;  %s2584_s14 = sshll.u32 %s3808_s10, 1 }
 0x158   : > { %v2839_v61 = vpop.f32.mrf.mxu1  ;;  %2932 = vmatprep.mubr.bf16.mxu0 %v1217_v53  ;;  %s1768_s12 = scvt.s32.f32 %s2584_s14 }
 0x15a   : > { %v2840_v62 = vpop.f32.mrf.mxu1 }
 0x15b   : > { %v2841_v6 = vadd.f32 %v2840_v62, %v2839_v61 }
 0x15c   : > { %v2842_v1 = vpop.f32.mrf.mxu1 }
 0x15d   : > { %v1221_v10 = vpack.c.bf16 %v2841_v6, %v2838_v5 }
 0x15e   : > { %v2843_v2 = vpop.f32.mrf.mxu1 }
 0x15f   : > { %2933 = vmatmul.mubr.bf16.gmra.mxu0 %v1218_v63  ;;  %v2844_v13 = vadd.f32 %v2843_v2, %v2842_v1 }
 0x160   : > { %v2845_v7 = vpop.f32.mrf.mxu1  ;;  %2936 = vmatprep.mubr.bf16.mxu0 %v1219_v0 }
 0x162   : > { %v2846_v8 = vpop.f32.mrf.mxu1 }
 0x163   : > { %v2847_v14 = vadd.f32 %v2846_v8, %v2845_v7 }
 0x164   : > { %v2848_v11 = vpop.f32.mrf.mxu1 }
 0x165   : > { %v1222_v18 = vpack.c.bf16 %v2847_v14, %v2844_v13 }
 0x166   : > { %v2849_v12 = vpop.f32.mrf.mxu1 }
 0x167   : > { %2937 = vmatmul.mubr.bf16.gmra.mxu0 %v1220_v9  ;;  %v2850_v16 = vadd.f32 %v2849_v12, %v2848_v11 }
 0x168   : > { %v2851_v15 = vpop.f32.mrf.mxu1  ;;  %2940 = vmatprep.mubr.bf16.mxu0 %v1221_v10 }
 0x16a   : > { %v2852_v17 = vpop.f32.mrf.mxu1 }
 0x16b   : > { %v2853_v19 = vadd.f32 %v2852_v17, %v2851_v15 }
 0x16c   : > { %v2854_v20 = vpop.f32.mrf.mxu1 }
 0x16d   : > { %v1223_v21 = vpack.c.bf16 %v2853_v19, %v2850_v16 }
 0x16e   : > { %v2855_v22 = vpop.f32.mrf.mxu1 }
 0x16f   : > { %2941 = vmatmul.mubr.bf16.gmra.mxu0 %v1222_v18  ;;  %v2856_v24 = vadd.f32 %v2855_v22, %v2854_v20 }
 0x170   : > { %v2857_v23 = vpop.f32.mrf.mxu1  ;;  %2944 = vmatprep.mubr.bf16.mxu0 %v1223_v21 }
 0x172   : > { %v2858_v25 = vpop.f32.mrf.mxu1 }
 0x173   : > { %v2859_v26 = vadd.f32 %v2858_v25, %v2857_v23 }
 0x174   : > { %v2860_v27 = vpop.f32.mrf.mxu1 }
 0x175   : > { %v1224_v28 = vpack.c.bf16 %v2859_v26, %v2856_v24 }
 0x176   : > { %v2861_v29 = vpop.f32.mrf.mxu1 }
 0x177   : > { %2945 = vmatmul.mubr.bf16.gmra.mxu0 %v1224_v28  ;;  %v2862_v31 = vadd.f32 %v2861_v29, %v2860_v27 }
 0x178   : > { %v2863_v30 = vpop.f32.mrf.mxu1 }
 0x17a   : > { %v2864_v32 = vpop.f32.mrf.mxu1 }
 0x17b   : > { %v2865_v33 = vadd.f32 %v2864_v32, %v2863_v30 }
 0x17c   : > { %v2866_v34 = vpop.f32.mrf.mxu1 }
 0x17d   : > { %v1225_v35 = vpack.c.bf16 %v2865_v33, %v2862_v31 }
 0x17e   : > { %v2867_v36 = vpop.f32.mrf.mxu1 }
 0x17f   : > { %2948 = vmatprep.mubr.bf16.mxu0 %v1225_v35  ;;  %v2868_v38 = vadd.f32 %v2867_v36, %v2866_v34 }
 0x180   : > { %v2869_v37 = vpop.f32.mrf.mxu1 }
 0x182   : > { %v2870_v39 = vpop.f32.mrf.mxu1 }
 0x183   : > { %v2871_v40 = vadd.f32 %v2870_v39, %v2869_v37 }
 0x184   : > { %v2872_v41 = vpop.f32.mrf.mxu1 }
 0x185   : > { %v1226_v42 = vpack.c.bf16 %v2871_v40, %v2868_v38 }
 0x186   : > { %v2873_v43 = vpop.f32.mrf.mxu1 }
 0x187   : > { %2949 = vmatmul.mubr.bf16.gmra.mxu0 %v1226_v42  ;;  %v2874_v45 = vadd.f32 %v2873_v43, %v2872_v41 }
 0x188   : > { %v2875_v44 = vpop.f32.mrf.mxu1 }
 0x18a   : > { %v2876_v46 = vpop.f32.mrf.mxu1 }
 0x18b   : > { %v2877_v47 = vadd.f32 %v2876_v46, %v2875_v44 }
 0x18c   : > { %v2878_v48 = vpop.f32.mrf.mxu1 }
 0x18d   : > { %v1227_v49 = vpack.c.bf16 %v2877_v47, %v2874_v45 }
 0x18e   : > { %v2879_v50 = vpop.f32.mrf.mxu1 }
 0x18f   : > { %2952 = vmatprep.mubr.bf16.mxu0 %v1227_v49  ;;  %v2880_v52 = vadd.f32 %v2879_v50, %v2878_v48 }
 0x190   : > { %v2881_v51 = vpop.f32.mrf.mxu1 }
 0x192   : > { %v2882_v53 = vpop.f32.mrf.mxu1 }
 0x193   : > { %v2883_v54 = vadd.f32 %v2882_v53, %v2881_v51 }
 0x195   : > { %v1228_v55 = vpack.c.bf16 %v2883_v54, %v2880_v52 }
 0x197   : > { %2953 = vmatmul.mubr.bf16.gmra.mxu0 %v1228_v55 }
 0x207   : > { %v2926_v57 = vpop.f32.mrf.mxu0 }
 0x208   : > { %v3633_v58 = vadd.f32 %v2926_v57, %v3630_v56 }
 0x209   : > { %v1311_v59 = vpop.f32.mrf.mxu0 }
 0x20a   : > { %v3636_v60 = vadd.f32 %v3630_v56, %v1311_v59  ;;  %v1479_v61 = vmul.f32 %v3633_v58, %v3633_v58 }
 0x20b   : > { %v2927_v62 = vpop.f32.mrf.mxu0 }
 0x20c   : > { %v3641_v63 = vadd.f32 %v2927_v62, %v3630_v56  ;;  %1513 = vadd.xlane.f32.xlu1 %v1479_v61  ;;  %v1477_v0 = vmul.f32 %v3636_v60, %v3636_v60 }
 0x20d   : > { %v1314_v1 = vpop.f32.mrf.mxu0 }
 0x20e   : > { %v3646_v2 = vadd.f32 %v3630_v56, %v1314_v1  ;;  %1509 = vadd.xlane.f32.xlu0 %v1477_v0  ;;  %v1480_v3 = vmul.f32 %v3641_v63, %v3641_v63 }
 0x210   : > { %1515 = vadd.xlane.f32.xlu1 %v1480_v3  ;;  %v1478_v4 = vmul.f32 %v3646_v2, %v3646_v2 }
 0x212   : > { %1511 = vadd.xlane.f32.xlu0 %v1478_v4 }
 0x217   : > { %v2930_v5 = vpop.f32.mrf.mxu0 }
 0x218   : > { %v3653_v6 = vadd.f32 %v2930_v5, %v3630_v56 }
 0x219   : > { %v1327_v7 = vpop.f32.mrf.mxu0 }
 0x21a   : > { %v3656_v8 = vadd.f32 %v3630_v56, %v1327_v7  ;;  %v1483_v9 = vmul.f32 %v3653_v6, %v3653_v6 }
 0x21b   : > { %v2931_v10 = vpop.f32.mrf.mxu0 }
 0x21c   : > { %v3661_v11 = vadd.f32 %v2931_v10, %v3630_v56  ;;  %1521 = vadd.xlane.f32.xlu0 %v1483_v9  ;;  %v1481_v14 = vmul.f32 %v3656_v8, %v3656_v8 }
 0x21d   : > { %v1330_v12 = vpop.f32.mrf.mxu0 }
 0x21e   : > { %v3664_v13 = vadd.f32 %v3630_v56, %v1330_v12  ;;  %v1484_v15 = vmul.f32 %v3661_v11, %v3661_v11 }
 0x21f   : > { %v2934_v16 = vpop.f32.mrf.mxu0 }
 0x220   : > { %v3671_v17 = vadd.f32 %v2934_v16, %v3630_v56  ;;  %1517 = vadd.xlane.f32.xlu0 %v1481_v14  ;;  %1523 = vadd.xlane.f32.xlu1 %v1484_v15  ;;  %v1482_v20 = vmul.f32 %v3664_v13, %v3664_v13 }
 0x221   : > { %v1343_v18 = vpop.f32.mrf.mxu0 }
 0x222   : > { %v3674_v19 = vadd.f32 %v3630_v56, %v1343_v18  ;;  %v1487_v21 = vmul.f32 %v3671_v17, %v3671_v17 }
 0x223   : > { %v2935_v22 = vpop.f32.mrf.mxu0 }
 0x224   : > { %v3681_v23 = vadd.f32 %v2935_v22, %v3630_v56  ;;  %1519 = vadd.xlane.f32.xlu1 %v1482_v20  ;;  %1529 = vadd.xlane.f32.xlu0 %v1487_v21  ;;  %v1485_v26 = vmul.f32 %v3674_v19, %v3674_v19 }
 0x225   : > { %v1346_v24 = vpop.f32.mrf.mxu0 }
 0x226   : > { %v3684_v25 = vadd.f32 %v3630_v56, %v1346_v24  ;;  %v1488_v27 = vmul.f32 %v3681_v23, %v3681_v23 }
 0x227   : > { %v2938_v28 = vpop.f32.mrf.mxu0 }
 0x228   : > { %v3691_v29 = vadd.f32 %v2938_v28, %v3630_v56  ;;  %1525 = vadd.xlane.f32.xlu0 %v1485_v26  ;;  %1531 = vadd.xlane.f32.xlu1 %v1488_v27  ;;  %v1486_v32 = vmul.f32 %v3684_v25, %v3684_v25 }
 0x229   : > { %v1359_v30 = vpop.f32.mrf.mxu0 }
 0x22a   : > { %v3694_v31 = vadd.f32 %v3630_v56, %v1359_v30  ;;  %v1491_v33 = vmul.f32 %v3691_v29, %v3691_v29 }
 0x22b   : > { %v2939_v34 = vpop.f32.mrf.mxu0 }
 0x22c   : > { %v3701_v35 = vadd.f32 %v2939_v34, %v3630_v56  ;;  %1527 = vadd.xlane.f32.xlu1 %v1486_v32  ;;  %1537 = vadd.xlane.f32.xlu0 %v1491_v33  ;;  %v1489_v36 = vmul.f32 %v3694_v31, %v3694_v31 }
 0x22d   : > { %v1362_v37 = vpop.f32.mrf.mxu0 }
 0x22e   : > { %v3706_v38 = vadd.f32 %v3630_v56, %v1362_v37  ;;  %v1492_v39 = vmul.f32 %v3701_v35, %v3701_v35 }
 0x22f   : > { %v2942_v40 = vpop.f32.mrf.mxu0 }
 0x230   : > { %v3711_v41 = vadd.f32 %v2942_v40, %v3630_v56  ;;  %1533 = vadd.xlane.f32.xlu0 %v1489_v36  ;;  %1539 = vadd.xlane.f32.xlu1 %v1492_v39  ;;  %v1490_v42 = vmul.f32 %v3706_v38, %v3706_v38 }
 0x231   : > { %v1375_v43 = vpop.f32.mrf.mxu0 }
 0x232   : > { %v3716_v44 = vadd.f32 %v3630_v56, %v1375_v43  ;;  %v1495_v45 = vmul.f32 %v3711_v41, %v3711_v41 }
 0x233   : > { %v2943_v46 = vpop.f32.mrf.mxu0 }
 0x234   : > { %v3721_v47 = vadd.f32 %v2943_v46, %v3630_v56  ;;  %1535 = vadd.xlane.f32.xlu1 %v1490_v42  ;;  %1545 = vadd.xlane.f32.xlu0 %v1495_v45  ;;  %v1493_v48 = vmul.f32 %v3716_v44, %v3716_v44 }
 0x235   : > { %v1378_v49 = vpop.f32.mrf.mxu0 }
 0x236   : > { %v3726_v50 = vadd.f32 %v3630_v56, %v1378_v49  ;;  %v1496_v51 = vmul.f32 %v3721_v47, %v3721_v47 }
 0x237   : > { %v2946_v52 = vpop.f32.mrf.mxu0 }
 0x238   : > { %v3731_v53 = vadd.f32 %v2946_v52, %v3630_v56  ;;  %1541 = vadd.xlane.f32.xlu0 %v1493_v48  ;;  %1547 = vadd.xlane.f32.xlu1 %v1496_v51  ;;  %v1494_v54 = vmul.f32 %v3726_v50, %v3726_v50 }
 0x239   : > { %v1391_v55 = vpop.f32.mrf.mxu0 }
 0x23a   : > { %v3736_v57 = vadd.f32 %v3630_v56, %v1391_v55  ;;  %v1499_v59 = vmul.f32 %v3731_v53, %v3731_v53 }
 0x23b   : > { %v2947_v61 = vpop.f32.mrf.mxu0 }
 0x23c   : > { %v3741_v62 = vadd.f32 %v2947_v61, %v3630_v56  ;;  %1543 = vadd.xlane.f32.xlu1 %v1494_v54  ;;  %1553 = vadd.xlane.f32.xlu0 %v1499_v59  ;;  %v1497_v0 = vmul.f32 %v3736_v57, %v3736_v57 }
 0x23d   : > { %v1394_v1 = vpop.f32.mrf.mxu0 }
 0x23e   : > { %v3746_v3 = vadd.f32 %v3630_v56, %v1394_v1  ;;  %v1500_v4 = vmul.f32 %v3741_v62, %v3741_v62 }
 0x240   : > { %1549 = vadd.xlane.f32.xlu0 %v1497_v0  ;;  %1555 = vadd.xlane.f32.xlu1 %v1500_v4  ;;  %v1498_v5 = vmul.f32 %v3746_v3, %v3746_v3 }
 0x244   : > { %1551 = vadd.xlane.f32.xlu1 %v1498_v5 }
 0x247   : > { %v2950_v7 = vpop.f32.mrf.mxu0 }
 0x248   : > { %v3753_v9 = vadd.f32 %v2950_v7, %v3630_v56 }
 0x249   : > { %v1407_v10 = vpop.f32.mrf.mxu0 }
 0x24a   : > { %v3756_v12 = vadd.f32 %v3630_v56, %v1407_v10  ;;  %v1503_v14 = vmul.f32 %v3753_v9, %v3753_v9 }
 0x24b   : > { %v2951_v15 = vpop.f32.mrf.mxu0 }
 0x24c   : > { %v3761_v16 = vadd.f32 %v2951_v15, %v3630_v56  ;;  %1561 = vadd.xlane.f32.xlu0 %v1503_v14  ;;  %v1501_v18 = vmul.f32 %v3756_v12, %v3756_v12 }
 0x24d   : > { %v1410_v20 = vpop.f32.mrf.mxu0 }
 0x24e   : > { %v3766_v21 = vadd.f32 %v3630_v56, %v1410_v20  ;;  %v1504_v22 = vmul.f32 %v3761_v16, %v3761_v16 }
 0x250   : > { %1557 = vadd.xlane.f32.xlu0 %v1501_v18  ;;  %1563 = vadd.xlane.f32.xlu1 %v1504_v22  ;;  %v1502_v24 = vmul.f32 %v3766_v21, %v3766_v21 }
 0x254   : > { %1559 = vadd.xlane.f32.xlu1 %v1502_v24 }
 0x257   : > { %v2954_v26 = vpop.f32.mrf.mxu0 }
 0x258   : > { %v3773_v27 = vadd.f32 %v2954_v26, %v3630_v56 }
 0x259   : > { %v1423_v28 = vpop.f32.mrf.mxu0 }
 0x25a   : > { %v3776_v30 = vadd.f32 %v3630_v56, %v1423_v28  ;;  %v1507_v32 = vmul.f32 %v3773_v27, %v3773_v27 }
 0x25b   : > { %v2955_v33 = vpop.f32.mrf.mxu0 }
 0x25c   : > { %v3781_v34 = vadd.f32 %v2955_v33, %v3630_v56  ;;  %1569 = vadd.xlane.f32.xlu0 %v1507_v32  ;;  %v1505_v36 = vmul.f32 %v3776_v30, %v3776_v30 }
 0x25d   : > { %v1426_v37 = vpop.f32.mrf.mxu0 }
 0x25e   : > { %v3786_v39 = vadd.f32 %v3630_v56, %v1426_v37  ;;  %v1508_v40 = vmul.f32 %v3781_v34, %v3781_v34 }
 0x260   : > { %1565 = vadd.xlane.f32.xlu0 %v1505_v36  ;;  %1571 = vadd.xlane.f32.xlu1 %v1508_v40  ;;  %v1506_v42 = vmul.f32 %v3786_v39, %v3786_v39 }
 0x264   : > { %1567 = vadd.xlane.f32.xlu1 %v1506_v42 }
 0x295   : > { %v1514_v43 = vpop.xlane.xlu1 %1513 }
 0x296   : > { %v1575_v45 = vmax.f32 %v1514_v43, 1e-24 }
 0x297   : > { %v1510_v46 = vpop.xlane.xlu0 %1509 }
 0x298   : > { %3118 = vrsqrt.f32 %v1575_v45  ;;  %v1573_v48 = vmax.f32 %v1510_v46, 1e-24 }
 0x299   : > { %v1516_v49 = vpop.xlane.xlu1 %1515 }
 0x29a   : > { %3120 = vrsqrt.f32 %v1573_v48  ;;  %v1576_v51 = vmax.f32 %v1516_v49, 1e-24 }
 0x29b   : > { %v1512_v52 = vpop.xlane.xlu0 %1511 }
 0x29c   : > { %3122 = vrsqrt.f32 %v1576_v51  ;;  %v1574_v56 = vmax.f32 %v1512_v52, 1e-24 }
 0x29e   : > { %3124 = vrsqrt.f32 %v1574_v56 }
 0x2a5   : > { %v3119_v54 = vpop.eup %3118  ;;  %v1522_v55 = vpop.xlane.xlu0 %1521 }
 0x2a6   : > { %v1579_v59 = vmax.f32 %v1522_v55, 1e-24  ;;  %v1639_v61 = vmul.f32 %v3119_v54, %v3633_v58  ;;  %v1769_v54 = vstv %s1768_s12 }
 0x2a7   : > { %v3121_v0 = vpop.eup %3120 }
 0x2a8   : > { %3126 = vrsqrt.f32 %v1579_v59  ;;  %vm1671_vm0 = vcmp.ge.f32.partialorder %v1639_v61, 0.0  ;;  %v1703_v1 = vmul.f32 0.01, %v1639_v61  ;;  %v1637_v4 = vmul.f32 %v3121_v0, %v3636_v60 }
 0x2a9   : > { %v3123_v5 = vpop.eup %3122  ;;  %v1518_v7 = vpop.xlane.xlu0 %1517 }
 0x2aa   : > { %v1524_v10 = vpop.xlane.xlu1 %1523  ;;  %v1577_v14 = vmax.f32 %v1518_v7, 1e-24  ;;  %v3794_v18 = vsel %vm1671_vm0, %v1639_v61, %v1703_v1  ;;  %vm1669_vm1 = vcmp.ge.f32.partialorder %v1637_v4, 0.0  ;;  %v1701_v22 = vmul.f32 0.01, %v1637_v4 }
 0x2ab   : > { %v1580_v15 = vmax.f32 %v1524_v10, 1e-24  ;;  %v3125_v20 = vpop.eup %3124  ;;  %1776 = vadd.xlane.f32.xlu0 %v3794_v18  ;;  %v1640_v58 = vmul.f32 %v3123_v5, %v3641_v63  ;;  %v1854_v42 = vmul.f32 %v3794_v18, %v3794_v18 }
 0x2ac   : > { %3128 = vrsqrt.f32 %v1577_v14  ;;  %v1638_v24 = vmul.f32 %v3125_v20, %v3646_v2  ;;  %v3799_v36 = vsel %vm1669_vm1, %v1637_v4, %v1701_v22 }
 0x2ad   : > { %3130 = vrsqrt.f32 %v1580_v15  ;;  %v1530_v26 = vpop.xlane.xlu0 %1529  ;;  %vm1672_vm2 = vcmp.ge.f32.partialorder %v1640_v58, 0.0  ;;  %v1704_v28 = vmul.f32 0.01, %v1640_v58  ;;  %v1852_v51 = vmul.f32 %v3799_v36, %v3799_v36 }
 0x2ae   : > { %v1520_v60 = vpop.xlane.xlu1 %1519  ;;  %v1583_v33 = vmax.f32 %v1530_v26, 1e-24  ;;  %v1702_v40 = vmul.f32 0.01, %v1638_v24  ;;  %vm1670_vm3 = vcmp.ge.f32.partialorder %v1638_v24, 0.0 }
 0x2af   : > { %v1578_v32 = vmax.f32 %v1520_v60, 1e-24  ;;  %1772 = vadd.xlane.f32.xlu0 %v3799_v36  ;;  %v3802_v37 = vsel %vm1672_vm2, %v1640_v58, %v1704_v28 }
 0x2b0   : > { %1778 = vadd.xlane.f32.xlu1 %v3802_v37  ;;  %v3810_v46 = vsel %vm1670_vm3, %v1638_v24, %v1702_v40  ;;  %v1855_v52 = vmul.f32 %v3802_v37, %v3802_v37 }
 0x2b1   : > { %3132 = vrsqrt.f32 %v1578_v32  ;;  %v1526_v63 = vpop.xlane.xlu0 %1525  ;;  %v1853_v5 = vmul.f32 %v3810_v46, %v3810_v46 }
 0x2b2   : > { %v1532_v2 = vpop.xlane.xlu1 %1531  ;;  %3134 = vrsqrt.f32 %v1583_v33  ;;  %v1581_v43 = vmax.f32 %v1526_v63, 1e-24 }
 0x2b3   : > { %v1584_v45 = vmax.f32 %v1532_v2, 1e-24  ;;  %1888 = vadd.xlane.f32.xlu0 %v1854_v42 }
 0x2b4   : > { %1774 = vadd.xlane.f32.xlu1 %v3810_v46  ;;  %3136 = vrsqrt.f32 %v1581_v43 }
 0x2b5   : > { %v3127_v48 = vpop.eup %3126  ;;  %3138 = vrsqrt.f32 %v1584_v45  ;;  %v1538_v0 = vpop.xlane.xlu0 %1537 }
 0x2b6   : > { %v1528_v49 = vpop.xlane.xlu1 %1527  ;;  %v1643_v56 = vmul.f32 %v3127_v48, %v3653_v6  ;;  %3140 = vrcp.f32 %v1769_v54  ;;  %v1587_v20 = vmax.f32 %v1538_v0, 1e-24 }
 0x2b7   : > { %v1582_v55 = vmax.f32 %v1528_v49, 1e-24  ;;  %1884 = vadd.xlane.f32.xlu0 %v1852_v51 }
 0x2b8   : > { %1890 = vadd.xlane.f32.xlu1 %v1855_v52  ;;  %vm1675_vm4 = vcmp.ge.f32.partialorder %v1643_v56, 0.0  ;;  %v1707_v59 = vmul.f32 0.01, %v1643_v56 }
 0x2b9   : > { %v3129_v61 = vpop.eup %3128  ;;  %3142 = vrsqrt.f32 %v1582_v55  ;;  %v1534_v26 = vpop.xlane.xlu0 %1533 }
 0x2ba   : > { %v3131_v1 = vpop.eup %3130  ;;  %v3819_v4 = vsel %vm1675_vm4, %v1643_v56, %v1707_v59  ;;  %v1641_v7 = vmul.f32 %v3129_v61, %v3656_v8  ;;  %v1540_v22 = vpop.xlane.xlu1 %1539  ;;  %3144 = vrsqrt.f32 %v1587_v20  ;;  %v1585_v33 = vmax.f32 %v1534_v26, 1e-24 }
 0x2bb   : > { %1784 = vadd.xlane.f32.xlu0 %v3819_v4  ;;  %v1644_v6 = vmul.f32 %v3131_v1, %v3661_v11  ;;  %v1858_v28 = vmul.f32 %v3819_v4, %v3819_v4  ;;  %v1588_v2 = vmax.f32 %v1540_v22, 1e-24 }
 0x2bc   : > { %1886 = vadd.xlane.f32.xlu1 %v1853_v5  ;;  %vm1673_vm5 = vcmp.ge.f32.partialorder %v1641_v7, 0.0  ;;  %v1705_v10 = vmul.f32 0.01, %v1641_v7  ;;  %3146 = vrsqrt.f32 %v1585_v33 }
 0x2bd   : > { %vm1676_vm6 = vcmp.ge.f32.partialorder %v1644_v6, 0.0  ;;  %v1708_v15 = vmul.f32 0.01, %v1644_v6  ;;  %3148 = vrsqrt.f32 %v1588_v2  ;;  %v1546_v54 = vpop.xlane.xlu0 %1545 }
 0x2be   : > { %v3133_v14 = vpop.eup %3132  ;;  %v3826_v58 = vsel %vm1673_vm5, %v1641_v7, %v1705_v10  ;;  %v1536_v43 = vpop.xlane.xlu1 %1535  ;;  %v1591_v1 = vmax.f32 %v1546_v54, 1e-24 }
 0x2bf   : > { %v1642_v24 = vmul.f32 %v3133_v14, %v3664_v13  ;;  %v3135_v60 = vpop.eup %3134  ;;  %1780 = vadd.xlane.f32.xlu0 %v3826_v58  ;;  %v3830_v8 = vsel %vm1676_vm6, %v1644_v6, %v1708_v15  ;;  %v1856_v45 = vmul.f32 %v3826_v58, %v3826_v58 }
 0x2c0   : > { %1786 = vadd.xlane.f32.xlu1 %v3830_v8  ;;  %v1647_v13 = vmul.f32 %v3135_v60, %v3671_v17  ;;  %v1859_v48 = vmul.f32 %v3830_v8, %v3830_v8  ;;  %v1586_v17 = vmax.f32 %v1536_v43, 1e-24 }
 0x2c1   : > { %vm1674_vm7 = vcmp.ge.f32.partialorder %v1642_v24, 0.0  ;;  %v1706_v11 = vmul.f32 0.01, %v1642_v24  ;;  %v3137_v32 = vpop.eup %3136  ;;  %v1542_v6 = vpop.xlane.xlu0 %1541 }
 0x2c2   : > { %v3139_v63 = vpop.eup %3138  ;;  %v1711_v49 = vmul.f32 0.01, %v1647_v13  ;;  %v1645_v51 = vmul.f32 %v3137_v32, %v3674_v19  ;;  %vm1679_vm8 = vcmp.ge.f32.partialorder %v1647_v13, 0.0  ;;  %3150 = vrsqrt.f32 %v1586_v17 }
 0x2c3   : > { %v3835_v40 = vsel %vm1674_vm7, %v1642_v24, %v1706_v11  ;;  %1896 = vadd.xlane.f32.xlu0 %v1858_v28  ;;  %v3141_v42 = vpop.eup %3140  ;;  %v1648_v52 = vmul.f32 %v3139_v63, %v3681_v23  ;;  %v1548_v23 = vpop.xlane.xlu1 %1547  ;;  %3152 = vrsqrt.f32 %v1591_v1 }
 0x2c4   : > { %1782 = vadd.xlane.f32.xlu1 %v3835_v40  ;;  %2972 = vpush %v3141_v42  ;;  %v3845_v55 = vsel %vm1679_vm8, %v1647_v13, %v1711_v49  ;;  %v1857_v59 = vmul.f32 %v3835_v40, %v3835_v40  ;;  %v1709_v61 = vmul.f32 0.01, %v1645_v51  ;;  %vm1677_vm9 = vcmp.ge.f32.partialorder %v1645_v51, 0.0 }
 0x2c5   : > { %v1712_v19 = vmul.f32 0.01, %v1648_v52  ;;  %vm1680_vm10 = vcmp.ge.f32.partialorder %v1648_v52, 0.0  ;;  %v1862_v15 = vmul.f32 %v3845_v55, %v3845_v55  ;;  %v1592_v24 = vmax.f32 %v1548_v23, 1e-24  ;;  %v1554_v42 = vpop.xlane.xlu0 %1553 }
 0x2c6   : > { %v3143_v56 = vpop.eup %3142  ;;  %v3851_v5 = vsel %vm1677_vm9, %v1645_v51, %v1709_v61  ;;  %v1595_v51 = vmax.f32 %v1554_v42, 1e-24 }
 0x2c7   : > { %1892 = vadd.xlane.f32.xlu0 %v1856_v45  ;;  %v1646_v0 = vmul.f32 %v3143_v56, %v3684_v25  ;;  %4494 = vst [vmem:[#allocation4_spill] sm:$0xff] %v3851_v5  ;;  %v3145_v7 = vpop.eup %3144  ;;  %v3854_v10 = vsel %vm1680_vm10, %v1648_v52, %v1712_v19  ;;  %v1589_v25 = vmax.f32 %v1542_v6, 1e-24  ;;  %v1544_v11 = vpop.xlane.xlu1 %1543  ;;  %v1860_v28 = vmul.f32 %v3851_v5, %v3851_v5 }
 0x2c8   : > { %1898 = vadd.xlane.f32.xlu1 %v1859_v48  ;;  %4495 = vst [vmem:[#allocation5_spill] sm:$0xff] %v3854_v10  ;;  %v1651_v20 = vmul.f32 %v3145_v7, %v3691_v29  ;;  %v1863_v32 = vmul.f32 %v3854_v10, %v3854_v10  ;;  %v1590_v29 = vmax.f32 %v1544_v11, 1e-24 }
 0x2c9   : > { %v1710_v14 = vmul.f32 0.01, %v1646_v0  ;;  %vm1678_vm11 = vcmp.ge.f32.partialorder %v1646_v0, 0.0  ;;  %v3147_v22 = vpop.eup %3146  ;;  %3154 = vrsqrt.f32 %v1589_v25  ;;  %v1550_v56 = vpop.xlane.xlu0 %1549 }
 0x2ca   : > { %v3149_v26 = vpop.eup %3148  ;;  %v1715_v33 = vmul.f32 0.01, %v1651_v20  ;;  %v1649_v13 = vmul.f32 %v3147_v22, %v3694_v31  ;;  %3156 = vrsqrt.f32 %v1592_v24  ;;  %vm1683_vm12 = vcmp.ge.f32.partialorder %v1651_v20, 0.0 }
 0x2cb   : > { %1792 = vadd.xlane.f32.xlu0 %v3845_v55  ;;  %v3860_v60 = vsel %vm1678_vm11, %v1646_v0, %v1710_v14  ;;  %v1652_v63 = vmul.f32 %v3149_v26, %v3701_v35  ;;  %3158 = vrsqrt.f32 %v1590_v29  ;;  %v1556_v35 = vpop.xlane.xlu1 %1555 }
 0x2cc   : > { %1894 = vadd.xlane.f32.xlu1 %v1857_v59  ;;  %4496 = vst [vmem:[#allocation6_spill] sm:$0xff] %v3860_v60  ;;  %v3869_v43 = vsel %vm1683_vm12, %v1651_v20, %v1715_v33  ;;  %v1861_v45 = vmul.f32 %v3860_v60, %v3860_v60  ;;  %v1713_v48 = vmul.f32 0.01, %v1649_v13  ;;  %vm1681_vm13 = vcmp.ge.f32.partialorder %v1649_v13, 0.0 }
 0x2cd   : > { %4497 = vst [vmem:[#allocation7_spill] sm:$0xff] %v3869_v43  ;;  %v1716_v31 = vmul.f32 0.01, %v1652_v63  ;;  %vm1684_vm14 = vcmp.ge.f32.partialorder %v1652_v63, 0.0  ;;  %v1866_v61 = vmul.f32 %v3869_v43, %v3869_v43  ;;  %3160 = vrsqrt.f32 %v1595_v51 }
 0x2ce   : > { %v3875_v17 = vsel %vm1681_vm13, %v1649_v13, %v1713_v48  ;;  %v1596_v1 = vmax.f32 %v1556_v35, 1e-24 }
 0x2cf   : > { %1788 = vadd.xlane.f32.xlu0 %v3851_v5  ;;  %v3151_v2 = vpop.eup %3150  ;;  %4498 = vst [vmem:[#allocation8_spill] sm:$0xff] %v3875_v17  ;;  %v3878_v54 = vsel %vm1684_vm14, %v1652_v63, %v1716_v31  ;;  %v1552_v6 = vpop.xlane.xlu1 %1551  ;;  %v1864_v14 = vmul.f32 %v3875_v17, %v3875_v17 }
 0x2d0   : > { %1794 = vadd.xlane.f32.xlu1 %v3854_v10  ;;  %v1650_v49 = vmul.f32 %v3151_v2, %v3706_v38  ;;  %v3153_v52 = vpop.eup %3152  ;;  %4499 = vst [vmem:[#allocation9_spill] sm:$0xff] %v3878_v54  ;;  %v1593_v38 = vmax.f32 %v1550_v56, 1e-24 }
 0x2d1   : > { %v1655_v19 = vmul.f32 %v3153_v52, %v3711_v41  ;;  %v1594_v41 = vmax.f32 %v1552_v6, 1e-24 }
 0x2d2   : > { %v1714_v59 = vmul.f32 0.01, %v1650_v49  ;;  %vm1682_vm15 = vcmp.ge.f32.partialorder %v1650_v49, 0.0  ;;  %3162 = vrsqrt.f32 %v1593_v38 }
 0x2d3   : > { %1904 = vadd.xlane.f32.xlu0 %v1862_v15  ;;  %v1867_v15 = vmul.f32 %v3878_v54, %v3878_v54  ;;  %v1719_v25 = vmul.f32 0.01, %v1655_v19  ;;  %3164 = vrsqrt.f32 %v1596_v1  ;;  %vm1687_vm0 = vcmp.ge.f32.partialorder %v1655_v19, 0.0 }
 0x2d4   : > { %1790 = vadd.xlane.f32.xlu1 %v3860_v60  ;;  %v3884_v23 = vsel %vm1682_vm15, %v1650_v49, %v1714_v59  ;;  %3166 = vrsqrt.f32 %v1594_v41 }
 0x2d5   : > { %4500 = vst [vmem:[#allocation10_spill] sm:$0xff] %v3884_v23  ;;  %v1562_v26 = vpop.xlane.xlu0 %1561  ;;  %v3893_v11 = vsel %vm1687_vm0, %v1655_v19, %v1719_v25 }
 0x2d6   : > { %v3155_v0 = vpop.eup %3154  ;;  %v1599_v13 = vmax.f32 %v1562_v26, 1e-24  ;;  %v1870_v48 = vmul.f32 %v3893_v11, %v3893_v11 }
 0x2d7   : > { %1900 = vadd.xlane.f32.xlu0 %v1860_v28  ;;  %v3157_v7 = vpop.eup %3156  ;;  %v1653_v20 = vmul.f32 %v3155_v0, %v3716_v44  ;;  %v1865_v28 = vmul.f32 %v3884_v23, %v3884_v23 }
 0x2d8   : > { %1906 = vadd.xlane.f32.xlu1 %v1863_v32  ;;  %v1656_v22 = vmul.f32 %v3157_v7, %v3721_v47  ;;  %v3159_v24 = vpop.eup %3158  ;;  %3168 = vrsqrt.f32 %v1599_v13 }
 0x2d9   : > { %v1717_v32 = vmul.f32 0.01, %v1653_v20  ;;  %vm1685_vm1 = vcmp.ge.f32.partialorder %v1653_v20, 0.0  ;;  %v1654_v33 = vmul.f32 %v3159_v24, %v3726_v50  ;;  %v1564_v47 = vpop.xlane.xlu1 %1563  ;;  %v1558_v2 = vpop.xlane.xlu0 %1557 }
 0x2da   : > { %v1720_v44 = vmul.f32 0.01, %v1656_v22  ;;  %vm1688_vm2 = vcmp.ge.f32.partialorder %v1656_v22, 0.0  ;;  %v3161_v63 = vpop.eup %3160  ;;  %v1597_v50 = vmax.f32 %v1558_v2, 1e-24 }
 0x2db   : > { %1800 = vadd.xlane.f32.xlu0 %v3869_v43  ;;  %v3899_v29 = vsel %vm1685_vm1, %v1653_v20, %v1717_v32  ;;  %vm1686_vm3 = vcmp.ge.f32.partialorder %v1654_v33, 0.0  ;;  %v1659_v31 = vmul.f32 %v3161_v63, %v3731_v53  ;;  %v1600_v51 = vmax.f32 %v1564_v47, 1e-24 }
 0x2dc   : > { %1902 = vadd.xlane.f32.xlu1 %v1861_v45  ;;  %v3902_v42 = vsel %vm1688_vm2, %v1656_v22, %v1720_v44  ;;  %v1718_v45 = vmul.f32 0.01, %v1654_v33  ;;  %v1868_v59 = vmul.f32 %v3899_v29, %v3899_v29  ;;  %3170 = vrsqrt.f32 %v1597_v50 }
 0x2dd   : > { %v1560_v56 = vpop.xlane.xlu1 %1559  ;;  %v1723_v38 = vmul.f32 0.01, %v1659_v31  ;;  %3172 = vrsqrt.f32 %v1600_v51  ;;  %vm1691_vm4 = vcmp.ge.f32.partialorder %v1659_v31, 0.0 }
 0x2de   : > { %v3908_v35 = vsel %vm1686_vm3, %v1654_v33, %v1718_v45  ;;  %v1598_v53 = vmax.f32 %v1560_v56, 1e-24 }
 0x2df   : > { %1796 = vadd.xlane.f32.xlu0 %v3875_v17  ;;  %v3163_v49 = vpop.eup %3162  ;;  %v3917_v6 = vsel %vm1691_vm4, %v1659_v31, %v1723_v38 }
 0x2e0   : > { %1802 = vadd.xlane.f32.xlu1 %v3878_v54  ;;  %v3165_v52 = vpop.eup %3164  ;;  %v1657_v19 = vmul.f32 %v3163_v49, %v3736_v57  ;;  %3174 = vrsqrt.f32 %v1598_v53  ;;  %v1874_v32 = vmul.f32 %v3917_v6, %v3917_v6 }
 0x2e1   : > { %v1660_v0 = vmul.f32 %v3165_v52, %v3741_v62  ;;  %v3167_v1 = vpop.eup %3166 }
 0x2e2   : > { %vm1689_vm5 = vcmp.ge.f32.partialorder %v1657_v19, 0.0  ;;  %v1658_v25 = vmul.f32 %v3167_v1, %v3746_v3 }
 0x2e3   : > { %1912 = vadd.xlane.f32.xlu0 %v1866_v61  ;;  %v1871_v61 = vmul.f32 %v3902_v42, %v3902_v42  ;;  %v1724_v57 = vmul.f32 0.01, %v1660_v0  ;;  %vm1692_vm6 = vcmp.ge.f32.partialorder %v1660_v0, 0.0 }
 0x2e4   : > { %1798 = vadd.xlane.f32.xlu1 %v3884_v23  ;;  %vm1690_vm7 = vcmp.ge.f32.partialorder %v1658_v25, 0.0 }
 0x2e5   : > { %v1570_v7 = vpop.xlane.xlu0 %1569  ;;  %v3169_v22 = vpop.eup %3168  ;;  %v3926_v26 = vsel %vm1692_vm6, %v1660_v0, %v1724_v57 }
 0x2e6   : > { %v1603_v20 = vmax.f32 %v1570_v7, 1e-24  ;;  %v1663_v44 = vmul.f32 %v3169_v22, %v3753_v9 }
 0x2e7   : > { %1908 = vadd.xlane.f32.xlu0 %v1864_v14  ;;  %v1869_v14 = vmul.f32 %v3908_v35, %v3908_v35 }
 0x2e8   : > { %1914 = vadd.xlane.f32.xlu1 %v1867_v15  ;;  %v1721_v15 = vmul.f32 0.01, %v1657_v19  ;;  %3176 = vrsqrt.f32 %v1603_v20  ;;  %v1727_v50 = vmul.f32 0.01, %v1663_v44  ;;  %vm1695_vm8 = vcmp.ge.f32.partialorder %v1663_v44, 0.0 }
 0x2e9   : > { %v1572_v62 = vpop.xlane.xlu1 %1571  ;;  %v1566_v24 = vpop.xlane.xlu0 %1565 }
 0x2ea   : > { %v3923_v41 = vsel %vm1689_vm5, %v1657_v19, %v1721_v15  ;;  %v1601_v3 = vmax.f32 %v1566_v24, 1e-24  ;;  %v3171_v33 = vpop.eup %3170  ;;  %v1604_v13 = vmax.f32 %v1572_v62, 1e-24  ;;  %v3941_v52 = vsel %vm1695_vm8, %v1663_v44, %v1727_v50 }
 0x2eb   : > { %1808 = vadd.xlane.f32.xlu0 %v3893_v11  ;;  %v3173_v63 = vpop.eup %3172  ;;  %v1872_v45 = vmul.f32 %v3923_v41, %v3923_v41  ;;  %v1661_v31 = vmul.f32 %v3171_v33, %v3756_v12  ;;  %v1878_v0 = vmul.f32 %v3941_v52, %v3941_v52 }
 0x2ec   : > { %1910 = vadd.xlane.f32.xlu1 %v1865_v28  ;;  %v1722_v28 = vmul.f32 0.01, %v1658_v25  ;;  %3178 = vrsqrt.f32 %v1601_v3  ;;  %v1664_v49 = vmul.f32 %v3173_v63, %v3761_v16 }
 0x2ed   : > { %v1568_v2 = vpop.xlane.xlu1 %1567  ;;  %3180 = vrsqrt.f32 %v1604_v13  ;;  %v3175_v51 = vpop.eup %3174  ;;  %vm1693_vm9 = vcmp.ge.f32.partialorder %v1661_v31, 0.0 }
 0x2ee   : > { %v3932_v47 = vsel %vm1690_vm7, %v1658_v25, %v1722_v28  ;;  %v1602_v9 = vmax.f32 %v1568_v2, 1e-24  ;;  %v1662_v12 = vmul.f32 %v3175_v51, %v3766_v21  ;;  %vm1696_vm10 = vcmp.ge.f32.partialorder %v1664_v49, 0.0 }
 0x2ef   : > { %1804 = vadd.xlane.f32.xlu0 %v3899_v29  ;;  %v1873_v56 = vmul.f32 %v3932_v47, %v3932_v47 }
 0x2f0   : > { %1810 = vadd.xlane.f32.xlu1 %v3902_v42  ;;  %3182 = vrsqrt.f32 %v1602_v9  ;;  %v1726_v53 = vmul.f32 0.01, %v1662_v12  ;;  %vm1694_vm11 = vcmp.ge.f32.partialorder %v1662_v12, 0.0 }
 0x2f2   : > { %v3956_v21 = vsel %vm1694_vm11, %v1662_v12, %v1726_v53 }
 0x2f3   : > { %1920 = vadd.xlane.f32.xlu0 %v1870_v48  ;;  %v1875_v48 = vmul.f32 %v3926_v26, %v3926_v26  ;;  %4503 = vst [vmem:[#allocation13_spill] sm:$0xff] %v3956_v21  ;;  %v1877_v24 = vmul.f32 %v3956_v21, %v3956_v21 }
 0x2f4   : > { %1806 = vadd.xlane.f32.xlu1 %v3908_v35 }
 0x2f5   : > { %v3177_v16 = vpop.eup %3176  ;;  %s2973_s13 = spop %2972 }
 0x2f6   : > { %v1667_v1 = vmul.f32 %v3177_v16, %v3773_v27 }
 0x2f7   : > { %1916 = vadd.xlane.f32.xlu0 %v1868_v59  ;;  %v1725_v59 = vmul.f32 0.01, %v1661_v31 }
 0x2f8   : > { %1922 = vadd.xlane.f32.xlu1 %v1871_v61  ;;  %v1728_v61 = vmul.f32 0.01, %v1664_v49  ;;  %v1731_v25 = vmul.f32 0.01, %v1667_v1  ;;  %vm1699_vm12 = vcmp.ge.f32.partialorder %v1667_v1, 0.0 }
 0x2f9   : > { %v3947_v38 = vsel %vm1693_vm9, %v1661_v31, %v1725_v59  ;;  %v3179_v7 = vpop.eup %3178 }
 0x2fa   : > { %4501 = vst [vmem:[#allocation11_spill] sm:$0xff] %v3947_v38  ;;  %v3950_v19 = vsel %vm1696_vm10, %v1664_v49, %v1728_v61  ;;  %v1876_v15 = vmul.f32 %v3947_v38, %v3947_v38  ;;  %v1665_v20 = vmul.f32 %v3179_v7, %v3776_v30  ;;  %v3965_v22 = vsel %vm1699_vm12, %v1667_v1, %v1731_v25 }
 0x2fb   : > { %1816 = vadd.xlane.f32.xlu0 %v3917_v6  ;;  %4502 = vst [vmem:[#allocation12_spill] sm:$0xff] %v3950_v19  ;;  %v1879_v57 = vmul.f32 %v3950_v19, %v3950_v19  ;;  %4504 = vst [vmem:[#allocation14_spill] sm:$0xff] %v3965_v22 }
 0x2fc   : > { %1918 = vadd.xlane.f32.xlu1 %v1869_v14  ;;  %v3181_v14 = vpop.eup %3180  ;;  %v1729_v28 = vmul.f32 0.01, %v1665_v20  ;;  %vm1697_vm13 = vcmp.ge.f32.partialorder %v1665_v20, 0.0 }
 0x2fd   : > { %v1668_v27 = vmul.f32 %v3181_v14, %v3781_v34  ;;  %v3183_v62 = vpop.eup %3182 }
 0x2fe   : > { %v1666_v3 = vmul.f32 %v3183_v62, %v3786_v39  ;;  %v3971_v30 = vsel %vm1697_vm13, %v1665_v20, %v1729_v28  ;;  %v1882_v39 = vmul.f32 %v3965_v22, %v3965_v22 }
 0x2ff   : > { %1812 = vadd.xlane.f32.xlu0 %v3923_v41  ;;  %vm1700_vm14 = vcmp.ge.f32.partialorder %v1668_v27, 0.0  ;;  %4505 = vst [vmem:[#allocation15_spill] sm:$0xff] %v3971_v30  ;;  %v1880_v33 = vmul.f32 %v3971_v30, %v3971_v30 }
 0x300   : > { %1818 = vadd.xlane.f32.xlu1 %v3926_v26  ;;  %v1730_v44 = vmul.f32 0.01, %v1666_v3  ;;  %vm1698_vm15 = vcmp.ge.f32.partialorder %v1666_v3, 0.0 }
 0x302   : > { %v3979_v13 = vsel %vm1698_vm15, %v1666_v3, %v1730_v44 }
 0x303   : > { %1928 = vadd.xlane.f32.xlu0 %v1874_v32  ;;  %v1732_v32 = vmul.f32 0.01, %v1668_v27  ;;  %4507 = vst [vmem:[#allocation17_spill] sm:$0xff] %v3979_v13  ;;  %v1881_v63 = vmul.f32 %v3979_v13, %v3979_v13 }
 0x304   : > { %1814 = vadd.xlane.f32.xlu1 %v3932_v47 }
 0x305   : > { %v3974_v34 = vsel %vm1700_vm14, %v1668_v27, %v1732_v32 }
 0x306   : > { %4506 = vst [vmem:[#allocation16_spill] sm:$0xff] %v3974_v34  ;;  %v1883_v2 = vmul.f32 %v3974_v34, %v3974_v34 }
 0x307   : > { %1924 = vadd.xlane.f32.xlu0 %v1872_v45 }
 0x308   : > { %1930 = vadd.xlane.f32.xlu1 %v1875_v48 }
 0x30b   : > { %1824 = vadd.xlane.f32.xlu0 %v3941_v52 }
 0x30c   : > { %1926 = vadd.xlane.f32.xlu1 %v1873_v56 }
 0x30f   : > { %1820 = vadd.xlane.f32.xlu0 %v3947_v38 }
 0x310   : > { %1826 = vadd.xlane.f32.xlu1 %v3950_v19 }
 0x313   : > { %1936 = vadd.xlane.f32.xlu0 %v1878_v0 }
 0x314   : > { %1822 = vadd.xlane.f32.xlu1 %v3956_v21 }
 0x317   : > { %1932 = vadd.xlane.f32.xlu0 %v1876_v15 }
 0x318   : > { %1938 = vadd.xlane.f32.xlu1 %v1879_v57 }
 0x31b   : > { %1832 = vadd.xlane.f32.xlu0 %v3965_v22 }
 0x31c   : > { %1934 = vadd.xlane.f32.xlu1 %v1877_v24 }
 0x31f   : > { %1828 = vadd.xlane.f32.xlu0 %v3971_v30 }
 0x320   : > { %1834 = vadd.xlane.f32.xlu1 %v3974_v34 }
 0x323   : > { %1940 = vadd.xlane.f32.xlu0 %v1880_v33 }
 0x324   : > { %1830 = vadd.xlane.f32.xlu1 %v3979_v13  ;;  %v4034_v13 = vstv %s2973_s13 }
 0x327   : > { %1944 = vadd.xlane.f32.xlu0 %v1882_v39 }
 0x328   : > { %1942 = vadd.xlane.f32.xlu1 %v1881_v63 }
 0x32c   : > { %1946 = vadd.xlane.f32.xlu1 %v1883_v2 }
 0x334   : > { %v1777_v45 = vpop.xlane.xlu0 %1776 }
 0x338   : > { %v1773_v48 = vpop.xlane.xlu0 %1772 }
 0x339   : > { %v1779_v50 = vpop.xlane.xlu1 %1778 }
 0x33c   : > { %v1889_v31 = vpop.xlane.xlu0 %1888 }
 0x33d   : > { %v1775_v9 = vpop.xlane.xlu1 %1774 }
 0x340   : > { %v1885_v49 = vpop.xlane.xlu0 %1884 }
 0x341   : > { %v1891_v51 = vpop.xlane.xlu1 %1890 }
 0x344   : > { %v1785_v56 = vpop.xlane.xlu0 %1784 }
 0x345   : > { %v1887_v59 = vpop.xlane.xlu1 %1886 }
 0x348   : > { %v3988_v61 = vpop.xlane.xlu0 %1780 }
 0x349   : > { %v3990_v12 = vpop.xlane.xlu1 %1786 }
 0x34c   : > { %v3992_v16 = vpop.xlane.xlu0 %1896 }
 0x34d   : > { %v3994_v53 = vpop.xlane.xlu1 %1782 }
 0x350   : > { %v3996_v0 = vpop.xlane.xlu0 %1892 }
 0x351   : > { %v3998_v1 = vpop.xlane.xlu1 %1898 }
 0x354   : > { %v4000_v7 = vpop.xlane.xlu0 %1792 }
 0x355   : > { %v4002_v14 = vpop.xlane.xlu1 %1894 }
 0x358   : > { %v4004_v15 = vpop.xlane.xlu0 %1788 }
 0x359   : > { %v4006_v57 = vpop.xlane.xlu1 %1794 }
 0x35c   : > { %v4008_v25 = vpop.xlane.xlu0 %1904 }
 0x35d   : > { %v4010_v20 = vpop.xlane.xlu1 %1790 }
 0x360   : > { %v4012_v27 = vpop.xlane.xlu0 %1900 }
 0x361   : > { %v4014_v62 = vpop.xlane.xlu1 %1906 }
 0x364   : > { %v4016_v24 = vpop.xlane.xlu0 %1800 }
 0x365   : > { %v4018_v28 = vpop.xlane.xlu1 %1902 }
 0x368   : > { %v4020_v32 = vpop.xlane.xlu0 %1796 }
 0x369   : > { %v4022_v3 = vpop.xlane.xlu1 %1802 }
 0x36c   : > { %v4024_v44 = vpop.xlane.xlu0 %1912 }
 0x36d   : > { %4508 = vst [vmem:[#allocation18_spill] sm:$0xff] %v4024_v44  ;;  %v4026_v33 = vpop.xlane.xlu1 %1798 }
 0x370   : > { %v4028_v39 = vpop.xlane.xlu0 %1908 }
 0x371   : > { %v4030_v63 = vpop.xlane.xlu1 %1914 }
 0x372   : > { %4509 = vst [vmem:[#allocation19_spill] sm:$0xff] %v4030_v63 }
 0x374   : > { %v1809_v2 = vpop.xlane.xlu0 %1808 }
 0x375   : > { %v4032_v34 = vpop.xlane.xlu1 %1910  ;;  %v1838_v54 = vadd.f32 %v1809_v2, %v1777_v45 }
 0x376   : > { %4510 = vst [vmem:[#allocation20_spill] sm:$0xff] %v4032_v34 }
 0x377   : > { %v4037_v30 = vmul.f32 %v4034_v13, %v1838_v54 }
 0x378   : > { %v1805_v23 = vpop.xlane.xlu0 %1804 }
 0x379   : > { %v1811_v22 = vpop.xlane.xlu1 %1810  ;;  %v1836_v43 = vadd.f32 %v1805_v23, %v1773_v48  ;;  %v1999_v63 = vmul.f32 %v4037_v30, %v4037_v30 }
 0x37a   : > { %v1839_v17 = vadd.f32 %v1811_v22, %v1779_v50 }
 0x37b   : > { %v4040_v10 = vmul.f32 %v4034_v13, %v1836_v43 }
 0x37c   : > { %v1921_v21 = vpop.xlane.xlu0 %1920  ;;  %v4046_v2 = vmul.f32 %v4034_v13, %v1839_v17 }
 0x37d   : > { %v1950_v60 = vadd.f32 %v1921_v21, %v1889_v31  ;;  %v1807_v19 = vpop.xlane.xlu1 %1806  ;;  %v1997_v21 = vmul.f32 %v4040_v10, %v4040_v10 }
 0x37e   : > { %v1837_v34 = vadd.f32 %v1807_v19, %v1775_v9 }
 0x37f   : > { %v1983_v45 = vmul.f32 %v4034_v13, %v1950_v60  ;;  %v2000_v60 = vmul.f32 %v4046_v2, %v4046_v2 }
 0x380   : > { %v1917_v23 = vpop.xlane.xlu0 %1916  ;;  %v4052_v31 = vmul.f32 %v4034_v13, %v1837_v34 }
 0x381   : > { %v2015_v48 = vsub.f32 %v1983_v45, %v1999_v63  ;;  %v1948_v54 = vadd.f32 %v1917_v23, %v1885_v49  ;;  %v1923_v38 = vpop.xlane.xlu1 %1922  ;;  %v2125_v23 = vlaneseq }
 0x382   : > { %v1951_v22 = vadd.f32 %v1923_v38, %v1891_v51  ;;  %v1998_v34 = vmul.f32 %v4052_v31, %v4052_v31 }
 0x383   : > { %v2063_v50 = vadd.f32 1e-05, %v2015_v48  ;;  %v1981_v43 = vmul.f32 %v4034_v13, %v1948_v54 }
 0x384   : > { %v1984_v17 = vmul.f32 %v4034_v13, %v1951_v22  ;;  %v1817_v19 = vpop.xlane.xlu0 %1816 }
 0x385   : > { %3184 = vrsqrt.f32 %v2063_v50  ;;  %v2013_v9 = vsub.f32 %v1981_v43, %v1997_v21  ;;  %v1919_v49 = vpop.xlane.xlu1 %1918  ;;  %v1842_v45 = vadd.f32 %v1817_v19, %v1785_v56 }
 0x386   : > { %v2016_v63 = vsub.f32 %v1984_v17, %v2000_v60  ;;  %v1949_v38 = vadd.f32 %v1919_v49, %v1887_v59  ;;  %v2126_v59 = vand.u32 127, %v2125_v23  ;;  %v2127_v17 = vstv %s3808_s10 }
 0x387   : > { %v2061_v51 = vadd.f32 1e-05, %v2013_v9  ;;  %v4062_v21 = vmul.f32 %v4034_v13, %v1842_v45  ;;  %v2045_v45 = vsub.f32 %v3899_v29, %v4040_v10  ;;  %v2048_v29 = vsub.f32 %v3902_v42, %v4046_v2 }
 0x388   : > { %v2064_v48 = vadd.f32 1e-05, %v2016_v63  ;;  %v1982_v54 = vmul.f32 %v4034_v13, %v1949_v38  ;;  %v1813_v5 = vpop.xlane.xlu0 %1812  ;;  %vm4074_vm0 = vcmp.lt.s32.totalorder %v2126_v59, %v2127_v17 }
 0x389   : > { %3186 = vrsqrt.f32 %v2061_v51  ;;  %v1819_v44 = vpop.xlane.xlu1 %1818  ;;  %v1840_v50 = vadd.f32 %v1813_v5, %v3988_v61  ;;  %v2003_v5 = vmul.f32 %v4062_v21, %v4062_v21 }
 0x38a   : > { %3188 = vrsqrt.f32 %v2064_v48  ;;  %v2014_v22 = vsub.f32 %v1982_v54, %v1998_v34  ;;  %v1843_v43 = vadd.f32 %v1819_v44, %v3990_v12  ;;  %v2031_v12 = vsub.f32 %v3794_v18, %v4037_v30 }
 0x38b   : > { %v4068_v49 = vmul.f32 %v4034_v13, %v1840_v50  ;;  %v2032_v18 = vsub.f32 %v3802_v37, %v4046_v2 }
 0x38c   : > { %v2062_v56 = vadd.f32 1e-05, %v2014_v22  ;;  %v1929_v60 = vpop.xlane.xlu0 %1928  ;;  %v4083_v44 = vmul.f32 %v4034_v13, %v1843_v43 }
 0x38d   : > { %v1954_v19 = vadd.f32 %v1929_v60, %v3992_v16  ;;  %v1815_v9 = vpop.xlane.xlu1 %1814  ;;  %v2047_v16 = vsub.f32 %v3893_v11, %v4037_v30  ;;  %v2001_v30 = vmul.f32 %v4068_v49, %v4068_v49 }
 0x38e   : > { %3190 = vrsqrt.f32 %v2062_v56  ;;  %v1841_v63 = vadd.f32 %v1815_v9, %v3994_v53  ;;  %v2029_v53 = vsub.f32 %v3799_v36, %v4040_v10  ;;  %v2004_v37 = vmul.f32 %v4083_v44, %v4083_v44 }
 0x38f   : > { %v1987_v61 = vmul.f32 %v4034_v13, %v1954_v19 }
 0x390   : > { %v1925_v51 = vpop.xlane.xlu0 %1924  ;;  %v4093_v11 = vmul.f32 %v4034_v13, %v1841_v63 }
 0x391   : > { %v2019_v23 = vsub.f32 %v1987_v61, %v2003_v5  ;;  %v1952_v48 = vadd.f32 %v1925_v51, %v3996_v0  ;;  %v1931_v34 = vpop.xlane.xlu1 %1930  ;;  %v2030_v0 = vsub.f32 %v3810_v46, %v4052_v31  ;;  %v2046_v46 = vsub.f32 %v3908_v35, %v4052_v31 }
 0x392   : > { %v3185_v54 = vpop.eup %3184  ;;  %v1955_v22 = vadd.f32 %v1931_v34, %v3998_v1  ;;  %v2002_v51 = vmul.f32 %v4093_v11, %v4093_v11 }
 0x393   : > { %v2095_v36 = vmul.f32 %v3185_v54, %v2031_v12  ;;  %v2111_v50 = vmul.f32 %v3185_v54, %v2047_v16  ;;  %v2067_v59 = vadd.f32 1e-05, %v2019_v23  ;;  %v1985_v10 = vmul.f32 %v4034_v13, %v1952_v48 }
 0x394   : > { %v1988_v56 = vmul.f32 %v4034_v13, %v1955_v22  ;;  %v1825_v43 = vpop.xlane.xlu0 %1824 }
 0x395   : > { %v4108_v1 = vsel %vm4074_vm0, %v2095_v36, 0.0  ;;  %v4112_v60 = vsel %vm4074_vm0, %v2111_v50, 0.0  ;;  %3192 = vrsqrt.f32 %v2067_v59  ;;  %v2017_v17 = vsub.f32 %v1985_v10, %v2001_v30  ;;  %v1927_v42 = vpop.xlane.xlu1 %1926 }
 0x396   : > { %v3187_v2 = vpop.eup %3186  ;;  %v2020_v19 = vsub.f32 %v1988_v56, %v2004_v37  ;;  %v1846_v9 = vadd.f32 %v1825_v43, %v4000_v7  ;;  %v1953_v63 = vadd.f32 %v1927_v42, %v4002_v14 }
 0x397   : > { %v3189_v5 = vpop.eup %3188  ;;  %v2093_v61 = vmul.f32 %v3187_v2, %v2029_v53  ;;  %v2109_v12 = vmul.f32 %v3187_v2, %v2045_v45  ;;  %v2065_v16 = vadd.f32 1e-05, %v2017_v17 }
 0x398   : > { %v2096_v23 = vmul.f32 %v3189_v5, %v2032_v18  ;;  %v2112_v48 = vmul.f32 %v3189_v5, %v2048_v29  ;;  %v2068_v34 = vadd.f32 1e-05, %v2020_v19  ;;  %v4121_v54 = vmul.f32 %v4034_v13, %v1846_v9  ;;  %v1821_v30 = vpop.xlane.xlu0 %1820 }
 0x399   : > { %v4125_v35 = vsel %vm4074_vm0, %v2093_v61, 0.0  ;;  %v4129_v7 = vsel %vm4074_vm0, %v2109_v12, 0.0  ;;  %3194 = vrsqrt.f32 %v2065_v16  ;;  %v1986_v14 = vmul.f32 %v4034_v13, %v1953_v63  ;;  %v1827_v31 = vpop.xlane.xlu1 %1826 }
 0x39a   : > { %v2163_v53 = vmax.f32 %v4125_v35, %v4108_v1  ;;  %v2184_v45 = vmax.f32 %v4129_v7, %v4112_v60  ;;  %v4138_v18 = vsel %vm4074_vm0, %v2096_v23, 0.0  ;;  %v4142_v22 = vsel %vm4074_vm0, %v2112_v48, 0.0 }
 0x39b   : > { %v3191_v36 = vpop.eup %3190  ;;  %3196 = vrsqrt.f32 %v2068_v34  ;;  %v2018_v50 = vsub.f32 %v1986_v14, %v2002_v51  ;;  %v1844_v29 = vadd.f32 %v1821_v30, %v4004_v15  ;;  %v1847_v37 = vadd.f32 %v1827_v31, %v4006_v57 }
 0x39c   : > { %v2094_v59 = vmul.f32 %v3191_v36, %v2030_v0  ;;  %v2110_v10 = vmul.f32 %v3191_v36, %v2046_v46  ;;  %v1937_v56 = vpop.xlane.xlu0 %1936  ;;  %v2007_v0 = vmul.f32 %v4121_v54, %v4121_v54  ;;  %v2035_v5 = vsub.f32 %v3819_v4, %v4062_v21 }
 0x39d   : > { %v2066_v43 = vadd.f32 1e-05, %v2018_v50  ;;  %v1958_v17 = vadd.f32 %v1937_v56, %v4008_v25  ;;  %v1823_v42 = vpop.xlane.xlu1 %1822  ;;  %v4163_v46 = vmul.f32 %v4034_v13, %v1844_v29  ;;  %v4166_v9 = vmul.f32 %v4034_v13, %v1847_v37 }
 0x39e   : > { %v4149_v2 = vsel %vm4074_vm0, %v2094_v59, 0.0  ;;  %v4153_v19 = vsel %vm4074_vm0, %v2110_v10, 0.0  ;;  %v2051_v61 = vsub.f32 %v3917_v6, %v4062_v21  ;;  %v2033_v48 = vsub.f32 %v3826_v58, %v4068_v49 }
 0x39f   : > { %v2164_v15 = vmax.f32 %v4149_v2, %v4138_v18  ;;  %v2185_v57 = vmax.f32 %v4153_v19, %v4142_v22  ;;  %3198 = vrsqrt.f32 %v2066_v43  ;;  %v1991_v25 = vmul.f32 %v4034_v13, %v1958_v17 }
 0x3a0   : > { %v1933_v63 = vpop.xlane.xlu0 %1932  ;;  %v1845_v36 = vadd.f32 %v1823_v42, %v4010_v20  ;;  %v2005_v4 = vmul.f32 %v4163_v46, %v4163_v46  ;;  %v2049_v58 = vsub.f32 %v3923_v41, %v4068_v49  ;;  %v2036_v29 = vsub.f32 %v3830_v8, %v4083_v44 }
 0x3a1   : > { %v2023_v12 = vsub.f32 %v1991_v25, %v2007_v0  ;;  %v1956_v16 = vadd.f32 %v1933_v63, %v4012_v27  ;;  %v1939_v51 = vpop.xlane.xlu1 %1938  ;;  %v2008_v27 = vmul.f32 %v4166_v9, %v4166_v9  ;;  %v2052_v37 = vsub.f32 %v3926_v26, %v4083_v44 }
 0x3a2   : > { %v3193_v23 = vpop.eup %3192  ;;  %v1959_v34 = vadd.f32 %v1939_v51, %v4014_v62  ;;  %v2034_v41 = vsub.f32 %v3835_v40, %v4093_v11  ;;  %v4200_v42 = vmul.f32 %v4034_v13, %v1845_v36  ;;  %v2050_v25 = vsub.f32 %v3932_v47, %v4093_v11 }
 0x3a3   : > { %v2099_v30 = vmul.f32 %v3193_v23, %v2035_v5  ;;  %v2115_v14 = vmul.f32 %v3193_v23, %v2051_v61  ;;  %v2071_v31 = vadd.f32 1e-05, %v2023_v12  ;;  %v1989_v6 = vmul.f32 %v4034_v13, %v1956_v16 }
 0x3a4   : > { %v1992_v21 = vmul.f32 %v4034_v13, %v1959_v34  ;;  %v1833_v50 = vpop.xlane.xlu0 %1832 }
 0x3a5   : > { %v4187_v62 = vsel %vm4074_vm0, %v2099_v30, 0.0  ;;  %v4191_v20 = vsel %vm4074_vm0, %v2115_v14, 0.0  ;;  %3200 = vrsqrt.f32 %v2071_v31  ;;  %v1935_v59 = vpop.xlane.xlu1 %1934  ;;  %v2021_v56 = vsub.f32 %v1989_v6, %v2005_v4 }
 0x3a6   : > { %v3195_v10 = vpop.eup %3194  ;;  %v2024_v43 = vsub.f32 %v1992_v21, %v2008_v27  ;;  %v1957_v8 = vadd.f32 %v1935_v59, %v4018_v28  ;;  %v1850_v11 = vadd.f32 %v1833_v50, %v4016_v24 }
 0x3a7   : > { %v2097_v49 = vmul.f32 %v3195_v10, %v2033_v48  ;;  %v2113_v17 = vmul.f32 %v3195_v10, %v2049_v58  ;;  %v2069_v63 = vadd.f32 1e-05, %v2021_v56  ;;  %v2039_v56 = vsub.f32 %v3845_v55, %v4121_v54 }
 0x3a8   : > { %v3197_v0 = vpop.eup %3196  ;;  %v2072_v5 = vadd.f32 1e-05, %v2024_v43  ;;  %v1829_v61 = vpop.xlane.xlu0 %1828  ;;  %v1990_v24 = vmul.f32 %v4034_v13, %v1957_v8  ;;  %v2055_v43 = vsub.f32 %v3941_v52, %v4121_v54  ;;  %v4514_v8 = vld [vmem:[#allocation4_spill] sm:$0xff] }
 0x3a9   : > { %v4207_v26 = vsel %vm4074_vm0, %v2097_v49, 0.0  ;;  %v4211_v40 = vsel %vm4074_vm0, %v2113_v17, 0.0  ;;  %v2100_v44 = vmul.f32 %v3197_v0, %v2036_v29  ;;  %v2116_v12 = vmul.f32 %v3197_v0, %v2052_v37  ;;  %v1835_v16 = vpop.xlane.xlu1 %1834 }
 0x3aa   : > { %v4217_v47 = vmax.f32 %v2163_v53, %v4207_v26  ;;  %v4223_v28 = vmax.f32 %v2184_v45, %v4211_v40  ;;  %3202 = vrsqrt.f32 %v2069_v63  ;;  %v2006_v53 = vmul.f32 %v4200_v42, %v4200_v42  ;;  %v4513_v63 = vld [vmem:[#allocation18_spill] sm:$0xff] }
 0x3ab   : > { %v4228_v51 = vsel %vm4074_vm0, %v2100_v44, 0.0  ;;  %v4232_v23 = vsel %vm4074_vm0, %v2116_v12, 0.0  ;;  %3204 = vrsqrt.f32 %v2072_v5  ;;  %v1848_v30 = vadd.f32 %v1829_v61, %v4020_v32  ;;  %v4515_v44 = vld [vmem:[#allocation11_spill] sm:$0xff] }
 0x3ac   : > { %v3199_v48 = vpop.eup %3198  ;;  %v2167_v45 = vmax.f32 %v4217_v47, %v4187_v62  ;;  %v2188_v34 = vmax.f32 %v4223_v28, %v4191_v20  ;;  %v1941_v14 = vpop.xlane.xlu0 %1940  ;;  %v1851_v4 = vadd.f32 %v1835_v16, %v4022_v3  ;;  %v2022_v21 = vsub.f32 %v1990_v24, %v2006_v53  ;;  %v4521_v28 = vld [vmem:[#allocation13_spill] sm:$0xff] }
 0x3ad   : > { %v2098_v31 = vmul.f32 %v3199_v48, %v2034_v41  ;;  %v2114_v36 = vmul.f32 %v3199_v48, %v2050_v25  ;;  %v1960_v6 = vadd.f32 %v1941_v14, %v4028_v39  ;;  %v1831_v27 = vpop.xlane.xlu1 %1830  ;;  %v4245_v50 = vmul.f32 %v4034_v13, %v1848_v30 }
 0x3ae   : > { %v1849_v58 = vadd.f32 %v1831_v27, %v4026_v33  ;;  %v4270_v39 = vmul.f32 %v4034_v13, %v1850_v11  ;;  %v2070_v29 = vadd.f32 1e-05, %v2022_v21  ;;  %v2037_v61 = vsub.f32 %v4514_v8, %v4163_v46  ;;  %v4516_v11 = vld [vmem:[#allocation20_spill] sm:$0xff]  ;;  %v4518_v27 = vld [vmem:[#allocation19_spill] sm:$0xff] }
 0x3af   : > { %v4250_v59 = vsel %vm4074_vm0, %v2098_v31, 0.0  ;;  %v4254_v32 = vsel %vm4074_vm0, %v2114_v36, 0.0  ;;  %v1993_v10 = vmul.f32 %v4034_v13, %v1960_v6  ;;  %v2009_v41 = vmul.f32 %v4245_v50, %v4245_v50  ;;  %v4517_v36 = vld [vmem:[#allocation5_spill] sm:$0xff] }
 0x3b0   : > { %v4261_v3 = vmax.f32 %v2164_v15, %v4250_v59  ;;  %v4267_v33 = vmax.f32 %v2185_v57, %v4254_v32  ;;  %v1945_v37 = vpop.xlane.xlu0 %1944  ;;  %v4277_v15 = vmul.f32 %v4034_v13, %v1851_v4  ;;  %3206 = vrsqrt.f32 %v2070_v29 }
 0x3b1   : > { %v1943_v49 = vpop.xlane.xlu1 %1942  ;;  %v4286_v55 = vmul.f32 %v4034_v13, %v1849_v58  ;;  %v2025_v54 = vsub.f32 %v1993_v10, %v2009_v41  ;;  %v1962_v5 = vadd.f32 %v1945_v37, %v4513_v63  ;;  %v2053_v12 = vsub.f32 %v4515_v44, %v4163_v46  ;;  %v4519_v10 = vld [vmem:[#allocation12_spill] sm:$0xff] }
 0x3b2   : > { %v3201_v57 = vpop.eup %3200  ;;  %v2168_v17 = vmax.f32 %v4261_v3, %v4228_v51  ;;  %v2189_v0 = vmax.f32 %v4267_v33, %v4232_v23  ;;  %v2011_v16 = vmul.f32 %v4270_v39, %v4270_v39  ;;  %v1961_v53 = vadd.f32 %v1943_v49, %v4516_v11 }
 0x3b3   : > { %v2103_v25 = vmul.f32 %v3201_v57, %v2039_v56  ;;  %v2119_v52 = vmul.f32 %v3201_v57, %v2055_v43  ;;  %v2073_v30 = vadd.f32 1e-05, %v2025_v54  ;;  %v1995_v14 = vmul.f32 %v4034_v13, %v1962_v5 }
 0x3b4   : > { %v2040_v46 = vsub.f32 %v4517_v36, %v4166_v9  ;;  %v2010_v4 = vmul.f32 %v4286_v55, %v4286_v55  ;;  %v1994_v6 = vmul.f32 %v4034_v13, %v1961_v53  ;;  %v2056_v3 = vsub.f32 %v4519_v10, %v4166_v9 }
 0x3b5   : > { %v4298_v48 = vsel %vm4074_vm0, %v2103_v25, 0.0  ;;  %v4302_v24 = vsel %vm4074_vm0, %v2119_v52, 0.0  ;;  %v1947_v31 = vpop.xlane.xlu1 %1946  ;;  %3208 = vrsqrt.f32 %v2073_v30  ;;  %v2027_v33 = vsub.f32 %v1995_v14, %v2011_v16 }
 0x3b6   : > { %v1963_v21 = vadd.f32 %v1947_v31, %v4518_v27  ;;  %v2012_v29 = vmul.f32 %v4277_v15, %v4277_v15  ;;  %v2026_v41 = vsub.f32 %v1994_v6, %v2010_v4  ;;  %v4522_v6 = vld [vmem:[#allocation8_spill] sm:$0xff] }
 0x3b7   : > { %v3203_v58 = vpop.eup %3202  ;;  %v2075_v52 = vadd.f32 1e-05, %v2027_v33  ;;  %v2041_v27 = vsub.f32 %v4522_v6, %v4245_v50 }
 0x3b8   : > { %v3205_v37 = vpop.eup %3204  ;;  %v2101_v56 = vmul.f32 %v3203_v58, %v2037_v61  ;;  %v2117_v43 = vmul.f32 %v3203_v58, %v2053_v12  ;;  %v1996_v49 = vmul.f32 %v4034_v13, %v1963_v21  ;;  %v2074_v63 = vadd.f32 1e-05, %v2026_v41 }
 0x3b9   : > { %v2104_v57 = vmul.f32 %v3205_v37, %v2040_v46  ;;  %v2120_v25 = vmul.f32 %v3205_v37, %v2056_v3  ;;  %3210 = vrsqrt.f32 %v2075_v52 }
 0x3ba   : > { %v4318_v54 = vsel %vm4074_vm0, %v2101_v56, 0.0  ;;  %v4322_v9 = vsel %vm4074_vm0, %v2117_v43, 0.0  ;;  %v2028_v5 = vsub.f32 %v1996_v49, %v2012_v29  ;;  %3212 = vrsqrt.f32 %v2074_v63  ;;  %v4527_v63 = vld [vmem:[#allocation17_spill] sm:$0xff] }
 0x3bb   : > { %v2169_v8 = vmax.f32 %v2167_v45, %v4318_v54  ;;  %v2190_v13 = vmax.f32 %v2188_v34, %v4322_v9  ;;  %v4334_v61 = vsel %vm4074_vm0, %v2104_v57, 0.0  ;;  %v4338_v44 = vsel %vm4074_vm0, %v2120_v25, 0.0  ;;  %v4520_v45 = vld [vmem:[#allocation6_spill] sm:$0xff] }
 0x3bc   : > { %v2076_v12 = vadd.f32 1e-05, %v2028_v5  ;;  %v2038_v11 = vsub.f32 %v4520_v45, %v4200_v42  ;;  %v2054_v34 = vsub.f32 %v4521_v28, %v4200_v42  ;;  %v4523_v42 = vld [vmem:[#allocation15_spill] sm:$0xff]  ;;  %v4526_v25 = vld [vmem:[#allocation10_spill] sm:$0xff]  ;;  %v2058_v5 = vsub.f32 %v4527_v63, %v4286_v55  ;;  %v4529_v45 = vld [vmem:[#allocation16_spill] sm:$0xff] }
 0x3bd   : > { %v2171_v16 = vmax.f32 %v2169_v8, %v4298_v48  ;;  %v2192_v47 = vmax.f32 %v2190_v13, %v4302_v24  ;;  %v3207_v53 = vpop.eup %3206  ;;  %v2057_v21 = vsub.f32 %v4523_v42, %v4245_v50  ;;  %v4525_v50 = vld [vmem:[#allocation14_spill] sm:$0xff]  ;;  %v2042_v52 = vsub.f32 %v4526_v25, %v4286_v55  ;;  %v4528_v13 = vld [vmem:[#allocation9_spill] sm:$0xff] }
 0x3be   : > { %3214 = vrsqrt.f32 %v2076_v12  ;;  %v2102_v30 = vmul.f32 %v3207_v53, %v2038_v11  ;;  %v2118_v14 = vmul.f32 %v3207_v53, %v2054_v34  ;;  %v2059_v43 = vsub.f32 %v4525_v50, %v4270_v39 }
 0x3bf   : > { %v2044_v12 = vsub.f32 %v4528_v13, %v4277_v15  ;;  %v2060_v11 = vsub.f32 %v4529_v45, %v4277_v15 }
 0x3c0   : > { %v4348_v31 = vsel %vm4074_vm0, %v2102_v30, 0.0  ;;  %v4352_v36 = vsel %vm4074_vm0, %v2118_v14, 0.0 }
 0x3c1   : > { %v2170_v46 = vmax.f32 %v2168_v17, %v4348_v31  ;;  %v2191_v4 = vmax.f32 %v2189_v0, %v4352_v36  ;;  %v4524_v0 = vld [vmem:[#allocation7_spill] sm:$0xff] }
 0x3c2   : > { %v3209_v58 = vpop.eup %3208  ;;  %v2043_v56 = vsub.f32 %v4524_v0, %v4270_v39 }
 0x3c3   : > { %v2105_v10 = vmul.f32 %v3209_v58, %v2041_v27  ;;  %v2121_v3 = vmul.f32 %v3209_v58, %v2057_v21  ;;  %v2172_v33 = vmax.f32 %v2170_v46, %v4334_v61  ;;  %v2193_v29 = vmax.f32 %v2191_v4, %v4338_v44 }
 0x3c5   : > { %v4364_v37 = vsel %vm4074_vm0, %v2105_v10, 0.0  ;;  %v4368_v17 = vsel %vm4074_vm0, %v2121_v3, 0.0 }
 0x3c6   : > { %v2173_v41 = vmax.f32 %v2171_v16, %v4364_v37  ;;  %v2194_v49 = vmax.f32 %v2192_v47, %v4368_v17  ;;  %v3211_v57 = vpop.eup %3210 }
 0x3c7   : > { %v3213_v8 = vpop.eup %3212  ;;  %v2107_v28 = vmul.f32 %v3211_v57, %v2043_v56  ;;  %v2123_v39 = vmul.f32 %v3211_v57, %v2059_v43 }
 0x3c8   : > { %v2106_v16 = vmul.f32 %v3213_v8, %v2042_v52  ;;  %v2122_v53 = vmul.f32 %v3213_v8, %v2058_v5 }
 0x3c9   : > { %v4386_v47 = vsel %vm4074_vm0, %v2107_v28, 0.0  ;;  %v4390_v30 = vsel %vm4074_vm0, %v2123_v39, 0.0 }
 0x3ca   : > { %v2175_v46 = vmax.f32 %v2173_v41, %v4386_v47  ;;  %v2196_v4 = vmax.f32 %v2194_v49, %v4390_v30  ;;  %v4396_v15 = vsel %vm4074_vm0, %v2106_v16, 0.0  ;;  %v4400_v6 = vsel %vm4074_vm0, %v2122_v53, 0.0 }
 0x3cb   : > { %v3215_v34 = vpop.eup %3214  ;;  %v2174_v27 = vmax.f32 %v2172_v33, %v4396_v15  ;;  %v2195_v42 = vmax.f32 %v2193_v29, %v4400_v6 }
 0x3cc   : > { %v2108_v55 = vmul.f32 %v3215_v34, %v2044_v12  ;;  %v2124_v14 = vmul.f32 %v3215_v34, %v2060_v11 }
 0x3ce   : > { %v4406_v21 = vsel %vm4074_vm0, %v2108_v55, 0.0  ;;  %v4410_v58 = vsel %vm4074_vm0, %v2124_v14, 0.0 }
 0x3cf   : > { %v2176_v10 = vmax.f32 %v2174_v27, %v4406_v21  ;;  %v2197_v3 = vmax.f32 %v2195_v42, %v4410_v58 }
 0x3d1   : > { %v2177_v0 = vmax.f32 %v2175_v46, %v2176_v10  ;;  %v2198_v56 = vmax.f32 %v2196_v4, %v2197_v3 }
 0x3d3   : > { %v2178_v50 = vrot.slane %v2177_v0, 4  ;;  %v2199_v43 = vrot.slane %v2198_v56, 4 }
 0x3d5   : > { %v2179_v41 = vmax.f32 %v2177_v0, %v2178_v50  ;;  %v2200_v33 = vmax.f32 %v2198_v56, %v2199_v43 }
 0x3d7   : > { %v2180_v49 = vrot.slane %v2179_v41, 2  ;;  %v2201_v29 = vrot.slane %v2200_v33, 2 }
 0x3d9   : > { %v2181_v57 = vmax.f32 %v2179_v41, %v2180_v49  ;;  %v2202_v25 = vmax.f32 %v2200_v33, %v2201_v29  ;;  %2207 = sbr.rel (%p2585_p3) target bundleno = 993 (0x3e1), region = 82 }
 0x3db   : > { %v2182_v52 = vrot.slane %v2181_v57, 1  ;;  %v2203_v63 = vrot.slane %v2202_v25, 1 }
 0x3dd   : > { %v2183_v5 = vmax.f32 %v2181_v57, %v2182_v52  ;;  %v2204_v38 = vmax.f32 %v2202_v25, %v2203_v63 }
 0x3de   : > { %vm2210_vm1 = vcmask 1041409  }
 0x3df   : > { %v2211_v8 = vsel %vm2210_vm1, %v2204_v38, %v2183_v5 }
 0x3e0   : > { %2213 = vst [vmem:[%s3445_s30] sm:$0x3] %v2211_v8 }
 0x3e1 PF: > { %p2586_p4 = scmp.le.s32.totalorder %s3254_s17, 0 }
 0x3e3   : > { %2217 = sbr.rel (%p2586_p4) target bundleno = 1005 (0x3ed), region = 86 }
 0x3e8   : > { %v2218_v13 = vld [vmem:[%s3445_s30] sm:$0x3]  ;;  %vm2221_vm2 = vcmask 1041409  }
 0x3e9   : > { %v2222_v12 = vsel %vm2221_vm2, %v2204_v38, %v2183_v5 }
 0x3ea   : > { %v2224_v45 = vmax.f32 %v2218_v13, %v2222_v12 }
 0x3ec   : > { %2225 = vst [vmem:[%s3445_s30] sm:$0x3] %v2224_v45 }
 0x3ed PF: > { %p2587_p5 = scmp.ge.s32.totalorder %s3258_s18, 2 }
 0x3ee   : > { %s2588_s11 = sshll.u32 (!%p2587_p5), %s3254_s17, 7  ;;  %s2621_s24 = sshll.u32 (!%p2587_p5), %s4545_s7, 6 }
 0x3ef   : > { %2229 = sbr.rel (%p2587_p5) target bundleno = 1023 (0x3ff), region = 90  ;;  %s2359_s30 = sshra.s32 (!%p2587_p5), %s2588_s11, 3 }
 0x3f0   : > { %s2362_s17 = sadd.s32 (!%p2587_p5), %s2621_s24, %s2359_s30 }
 0x3f1   : > { %s2622_s18 = sshll.u32 (!%p2587_p5), %s2362_s17, 2 }
 0x3f2   : > { %s2364_s25 = scalar_lea.vmem (!%p2587_p5), [#allocation2], %s2622_s18 }
 0x3f4   : > { %v2664_v11 = vpack.c.bf16 %v4149_v2, %v4125_v35  ;;  %v2669_v28 = vpack.c.bf16 %v4138_v18, %v4108_v1  ;;  %v2674_v39 = vpack.c.bf16 %v4250_v59, %v4207_v26  ;;  %v2679_v34 = vpack.c.bf16 %v4228_v51, %v4187_v62 }
 0x3f5   : > { %v2684_v16 = vpack.c.bf16 %v4348_v31, %v4318_v54  ;;  %v2689_v53 = vpack.c.bf16 %v4334_v61, %v4298_v48  ;;  %v2694_v55 = vpack.c.bf16 %v4396_v15, %v4364_v37  ;;  %v2699_v35 = vpack.c.bf16 %v4406_v21, %v4386_v47 }
 0x3f6   : > { %v2704_v1 = vpack.c.bf16 %v4153_v19, %v4129_v7  ;;  %v2709_v18 = vpack.c.bf16 %v4142_v22, %v4112_v60  ;;  %v2714_v2 = vpack.c.bf16 %v4254_v32, %v4211_v40  ;;  %v2719_v62 = vpack.c.bf16 %v4232_v23, %v4191_v20  ;;  %2665 = vst [vmem:[%s2364_s25] sm:$0xff] %v2664_v11  }
 0x3f7   : > { %v2724_v26 = vpack.c.bf16 %v4352_v36, %v4322_v9  ;;  %v2729_v51 = vpack.c.bf16 %v4338_v44, %v4302_v24  ;;  %v2734_v59 = vpack.c.bf16 %v4400_v6, %v4368_v17  ;;  %v2739_v7 = vpack.c.bf16 %v4410_v58, %v4390_v30  ;;  %2741 = vst [vmem:[%s2364_s25 + $0x8] sm:$0xff] %v2669_v28  }
 0x3f8   : > { %2742 = vst [vmem:[%s2364_s25 + $0x10] sm:$0xff] %v2674_v39   ;;  %2743 = vst [vmem:[%s2364_s25 + $0x18] sm:$0xff] %v2679_v34  }
 0x3f9   : > { %2744 = vst [vmem:[%s2364_s25 + $0x20] sm:$0xff] %v2684_v16   ;;  %2745 = vst [vmem:[%s2364_s25 + $0x28] sm:$0xff] %v2689_v53  }
 0x3fa   : > { %2746 = vst [vmem:[%s2364_s25 + $0x30] sm:$0xff] %v2694_v55   ;;  %2747 = vst [vmem:[%s2364_s25 + $0x38] sm:$0xff] %v2699_v35  }
 0x3fb   : > { %2748 = vst [vmem:[%s2364_s25 + $0x80] sm:$0xff] %v2704_v1   ;;  %2749 = vst [vmem:[%s2364_s25 + $0x88] sm:$0xff] %v2709_v18  }
 0x3fc   : > { %2750 = vst [vmem:[%s2364_s25 + $0x90] sm:$0xff] %v2714_v2   ;;  %2751 = vst [vmem:[%s2364_s25 + $0x98] sm:$0xff] %v2719_v62  }
 0x3fd   : > { %2752 = vst [vmem:[%s2364_s25 + $0xa0] sm:$0xff] %v2724_v26   ;;  %2753 = vst [vmem:[%s2364_s25 + $0xa8] sm:$0xff] %v2729_v51  }
 0x3fe   : > { %2754 = vst [vmem:[%s2364_s25 + $0xb0] sm:$0xff] %v2734_v59   ;;  %2755 = vst [vmem:[%s2364_s25 + $0xb8] sm:$0xff] %v2739_v7  }
 0x3ff PF: > { %s14_s21 = sadd.s32 1, %s3270_s21   ;;  %s4530_s15 = smov %s3250_s16 }
 0x400   : > { %p11_p6 = scmp.ge.s32.totalorder %s14_s21, 8   ;;  %s4531_s16 = smov %s3346_s26 }
 0x401   : > { %s4532_s17 = smov %s3262_s19  ;;  %s4533_s18 = smov %s3266_s20 }
 0x402   : > { %s4534_s19 = smov %s4537_s22  ;;  %s4535_s20 = smov %s4541_s23 }
 0x403   :  { %13 = sbr.rel (!%p11_p6) target bundleno = 4 (0x4), region = 133 }

</bundles_post_ra>
